<compile_context>
chip_gen: v6e
topology: v6e:2x2x1
jax: 0.10.0
libtpu: 0.0.40
codegen_flags: <defaults>
</compile_context>

<pallas_src>
import functools

import jax
import jax.numpy as jnp
import numpy as np
from jax import lax
from jax.experimental import pallas as pl
from jax.experimental.pallas import tpu as pltpu

LANE = 128


def _ceil_to(x, m):
    return ((x + m - 1) // m) * m


def _pad2(x, rows, cols):
    """Zero-pad a 2-D array up to (rows, cols) in f32."""
    out = jnp.zeros((rows, cols), jnp.float32)
    return out.at[:x.shape[0], :x.shape[1]].set(x.astype(jnp.float32))


# ----------------------------------------------------------------------------
# Fused kernel: MemN2N + (block-diagonal) dialogue+image MLP heads, one launch.
# ----------------------------------------------------------------------------
def decision_kernel(acts_ref, img_ref, memw_ref, mlp_w_ref, mlp_b_ref, out_ref,
                    *, batch, n_query, sent_len, hops, pad, rows_mlp):
    f32 = jnp.float32
    P = pad
    B = batch
    Q = n_query
    L = sent_len
    BQ = B * Q
    nproj = (1 + 2 * hops) * P

    # Up-cast the bf16 memory-weight slab once (outside all loops).
    memw = memw_ref[...].astype(f32)                     # (P, (3+2h)*P)
    acts = acts_ref[...]                                 # (BQ+BL, P) f32

    # One fused projection matmul: [qsum ; ssum] @ [B | A0 | C0 | A1 | C1].
    # (sum-before-matmul linearity was already applied in the wrapper.)
    proj = jnp.dot(acts, memw[:, :nproj], preferred_element_type=f32)
    u = proj[:BQ, :P]                                    # qsum @ B
    H = memw[:, nproj:nproj + P]
    Wm = memw[:, nproj + P:nproj + 2 * P]

    def softmax_over_batch(xs):
        # Legacy F.softmax(no dim) on a 3-D tensor == softmax over dim 0 (the
        # batch dim).  xs is a per-batch list of 2-D tiles; staying 2-D avoids
        # 3-D relayouts.  One reciprocal (exact) + multiplies per softmax.
        mx = xs[0]
        for x in xs[1:]:
            mx = jnp.maximum(mx, x)
        es = [jnp.exp(x - mx) for x in xs]
        den = es[0]
        for e in es[1:]:
            den = den + e
        inv = pl.reciprocal(den, approx=False)
        return [e * inv for e in es]

    for i in range(hops):
        m_in = proj[BQ:, (1 + 2 * i) * P:(2 + 2 * i) * P]   # ssum @ A_i  (BL, P)
        c_i = proj[BQ:, (2 + 2 * i) * P:(3 + 2 * i) * P]    # ssum @ C_i  (BL, P)

        # scores_b = u_b @ m_b^T  (plain 2-D dots, unrolled tiny static batch)
        s_list = []
        for b in range(B):
            u_b = u[b * Q:(b + 1) * Q, :]                   # (Q, P)
            m_b = m_in[b * L:(b + 1) * L, :]                # (L, P)
            s_list.append(lax.dot_general(
                u_b, m_b, (((1,), (1,)), ((), ())),
                preferred_element_type=f32))                # (Q, L)

        p_list = softmax_over_batch(s_list)

        o_list = []
        for b in range(B):
            c_b = c_i[b * L:(b + 1) * L, :]                 # (L, P)
            o_list.append(jnp.dot(p_list[b], c_b,
                                  preferred_element_type=f32))   # (Q, P)
        o = jnp.concatenate(o_list, axis=0)                 # (BQ, P)

        u = jnp.dot(u, H, preferred_element_type=f32) + o

    logits = jnp.dot(u, Wm, preferred_element_type=f32)     # (BQ, P)
    l_list = [logits[b * Q:(b + 1) * Q, :] for b in range(B)]
    # Padded lanes of `logits` are exactly 0 -> softmax puts 1/B there, which
    # is harmless because the dia block of mlp_w[0] has zero rows past
    # key_size (bf16 keeps those zeros exact).
    a_h = jnp.concatenate(softmax_over_batch(l_list), axis=0)   # (BQ, P)

    if BQ < rows_mlp:
        a_h = jnp.concatenate(
            [a_h, jnp.zeros((rows_mlp - BQ, P), f32)], axis=0)

    # Lane-stacked activation slab [a_h | img]; block-diagonal weights keep
    # the two halves exactly independent, so one 256-wide matmul per layer
    # computes both heads.
    h = jnp.concatenate([a_h, img_ref[...]], axis=1)        # (rows_mlp, 2P)
    for j in range(5):
        w_j = mlp_w_ref[j].astype(f32)                      # (2P, 2P)
        b_j = mlp_b_ref[j]                                  # (1, 2P) f32
        h = jnp.dot(h, w_j, preferred_element_type=f32) + b_j
        if j < 4:
            h = jnp.maximum(h, 0.0)
    out_ref[...] = h                                        # lane-dense store


# ----------------------------------------------------------------------------
# One-time parameter preparation (padding / packing / bf16 cast).
# ----------------------------------------------------------------------------
def prepare_params(params):
    mem = params['mem']
    hops = params['hops']
    E = mem['B'].shape[0]
    d = mem['B'].shape[1]
    key_size = mem['W'].shape[1]
    res_size = params['dia_w'][-1].shape[1]
    img_emb = params['img_w'][0].shape[0]

    dims = [E, d, key_size, res_size, img_emb]
    for w in params['dia_w'] + params['img_w']:
        dims += [w.shape[0], w.shape[1]]
    P = _ceil_to(max(dims), LANE)

    # Memory-network weights: one lane-dense slab [B | A0 | C0 | ... | H | W].
    blocks = [_pad2(mem['B'], P, P)]
    for i in range(hops):
        blocks.append(_pad2(mem['A'][i], P, P))
        blocks.append(_pad2(mem['C'][i], P, P))
    blocks.append(_pad2(mem['H'], P, P))
    blocks.append(_pad2(mem['W'], P, P))
    memw = jnp.concatenate(blocks, axis=1).astype(jnp.bfloat16)   # (P, (3+2h)P)

    # Fused MLP heads: block-diagonal(dia, img) weights, concatenated biases.
    def blockdiag(wd, wi):
        out = jnp.zeros((2 * P, 2 * P), jnp.float32)
        out = out.at[:wd.shape[0], :wd.shape[1]].set(wd.astype(jnp.float32))
        out = out.at[P:P + wi.shape[0], P:P + wi.shape[1]].set(
            wi.astype(jnp.float32))
        return out

    mlp_w = jnp.stack([blockdiag(dw, iw)
                       for dw, iw in zip(params['dia_w'], params['img_w'])]
                      ).astype(jnp.bfloat16)                      # (5, 2P, 2P)

    def bias_row(db, ib):
        out = jnp.zeros((1, 2 * P), jnp.float32)
        out = out.at[:, :db.shape[1]].set(db.astype(jnp.float32))
        out = out.at[:, P:P + ib.shape[1]].set(ib.astype(jnp.float32))
        return out

    mlp_b = jnp.stack([bias_row(db, ib)
                       for db, ib in zip(params['dia_b'], params['img_b'])])
    # biases stay f32: their bf16 rounding would sit at the tolerance limit.

    return dict(P=P, hops=hops, emb_size=E, img_emb_size=img_emb,
                res_size=res_size, memw=memw, mlp_w=mlp_w, mlp_b=mlp_b)


# ----------------------------------------------------------------------------
# Per-call wrapper: pre-reduce + tile-pad activations, one pallas_call.
# ----------------------------------------------------------------------------
def make_decision_forward(prepared, *, batch, n_query, sent_len):
    P = prepared['P']
    hops = prepared['hops']
    E = prepared['emb_size']
    img_emb = prepared['img_emb_size']
    res_size = prepared['res_size']
    memw = prepared['memw']
    mlp_w = prepared['mlp_w']
    mlp_b = prepared['mlp_b']

    BQ = batch * n_query
    BL = batch * sent_len
    R = _ceil_to(max(BQ, batch), 8)      # MLP slab rows (sublane aligned)

    kern = functools.partial(decision_kernel, batch=batch, n_query=n_query,
                             sent_len=sent_len, hops=hops, pad=P, rows_mlp=R)
    vmem = lambda: pl.BlockSpec(memory_space=pltpu.MemorySpace.VMEM)

    call = pl.pallas_call(
        kern,
        out_shape=jax.ShapeDtypeStruct((R, 2 * P), jnp.float32),
        in_specs=[vmem() for _ in range(5)],
        out_specs=vmem(),
    )

    @jax.jit
    def forward(stories, queries, img):
        # Sum-before-matmul (exact by linearity): removes the S x / L x
        # redundant rows before the embedding projections.
        ssum = stories.astype(jnp.float32).sum(axis=1).reshape(BL, E)
        qsum = queries.astype(jnp.float32).sum(axis=2).reshape(BQ, E)

        # Tile-aligned activation slabs (zero padding is exact).
        acts = jnp.zeros((BQ + BL, P), jnp.float32)
        acts = acts.at[:BQ, :E].set(qsum).at[BQ:, :E].set(ssum)
        img_slab = jnp.zeros((R, P), jnp.float32)
        img_slab = img_slab.at[:batch, :img_emb].set(img.astype(jnp.float32))

        out = call(acts, img_slab, memw, mlp_w, mlp_b)      # (R, 2P)

        dia_res = out[:BQ, :res_size].reshape(batch, n_query, res_size)
        img_res = out[:batch, P:P + res_size]
        return dia_res, img_res

    return forward


# ----------------------------------------------------------------------------
# Pure-JAX reference (mirrors the PyTorch forward, incl. legacy softmax dim=0)
# ----------------------------------------------------------------------------
def reference_forward(stories, queries, img, params):
    mem = params['mem']
    hops = params['hops']
    B, S, L, E = stories.shape
    _, Q, _, _ = queries.shape

    def softmax0(x):
        m = jnp.max(x, axis=0, keepdims=True)
        e = jnp.exp(x - m)
        return e / jnp.sum(e, axis=0, keepdims=True)

    u = jnp.einsum('bqle,ed->bqld', queries, mem['B']).sum(axis=2)
    for i in range(hops):
        m_in = jnp.einsum('bsle,ed->bsld', stories, mem['A'][i]).sum(axis=1)
        c = jnp.einsum('bsle,ed->bsld', stories, mem['C'][i]).sum(axis=1)
        p = softmax0(jnp.einsum('bqd,bld->bql', u, m_in))
        o = jnp.einsum('bql,bld->bqd', p, c)
        u = jnp.einsum('bqd,de->bqe', u, mem['H']) + o
    a_h = softmax0(jnp.einsum('bqd,dk->bqk', u, mem['W']))

    def mlp(x, ws, bs):
        h = x
        for j, (w, b) in enumerate(zip(ws, bs)):
            h = h @ w + b
            if j < 4:
                h = jnp.maximum(h, 0.0)
        return h

    dia = mlp(a_h.reshape(B * Q, -1), params['dia_w'], params['dia_b'])
    img_res = mlp(img, params['img_w'], params['img_b'])
    return dia.reshape(B, Q, -1), img_res


# ----------------------------------------------------------------------------
# Deterministic parameter init (synthetic, matches __init__ shapes)
# ----------------------------------------------------------------------------
def init_params(key, *, res_size, emb_size, img_emb_size, key_size, hops):
    d = emb_size * 2
    keys = jax.random.split(key, 32)
    it = iter(keys)
    nrm = lambda shape: 0.01 * jax.random.normal(next(it), shape, jnp.float32)

    mem = dict(A=nrm((hops, emb_size, d)),
               B=nrm((emb_size, d)),
               C=nrm((hops, emb_size, d)),
               H=nrm((d, d)),
               W=nrm((d, key_size)))

    def mlp_dims(d_in, h1, h2, h3, h4, d_out):
        return [(d_in, h1), (h1, h2), (h2, h3), (h3, h4), (h4, d_out)]

    dia_dims = mlp_dims(key_size, key_size * 2, key_size * 4,
                        res_size * 4, res_size * 2, res_size)
    img_dims = mlp_dims(img_emb_size, img_emb_size * 2, img_emb_size * 4,
                        res_size * 4, res_size * 2, res_size)

    # weights stored as (in, out) so the kernel computes y = x @ W + b
    dia_w = [nrm(s) for s in dia_dims]
    dia_b = [nrm((1, s[1])) for s in dia_dims]
    img_w = [nrm(s) for s in img_dims]
    img_b = [nrm((1, s[1])) for s in img_dims]

    return dict(mem=mem, hops=hops, dia_w=dia_w, dia_b=dia_b,
                img_w=img_w, img_b=img_b)


if __name__ == "__main__":
    batch, Q, S, L = 2, 4, 4, 8
    emb_size, key_size, res_size, img_emb = 8, 16, 8, 8
    hops = 2

    key = jax.random.PRNGKey(0)
    kp, ks, kq, ki = jax.random.split(key, 4)
    params = init_params(kp, res_size=res_size, emb_size=emb_size,
                         img_emb_size=img_emb, key_size=key_size, hops=hops)

    stories = jax.random.normal(ks, (batch, S, L, emb_size), jnp.float32)
    queries = jax.random.normal(kq, (batch, Q, L, emb_size), jnp.float32)
    img = jax.random.normal(ki, (batch, img_emb), jnp.float32)

    prepared = prepare_params(params)                     # one-time packing
    forward = make_decision_forward(prepared, batch=batch, n_query=Q,
                                    sent_len=L)

    dia_res, img_res = forward(stories, queries, img)
    jax.block_until_ready((dia_res, img_res))

    assert dia_res.shape == (batch, Q, res_size), dia_res.shape
    assert img_res.shape == (batch, res_size), img_res.shape

    ref_dia, ref_img = reference_forward(stories, queries, img, params)
    assert np.allclose(np.asarray(dia_res), np.asarray(ref_dia),
                       rtol=1e-3, atol=1e-5), "dia head mismatch vs reference"
    assert np.allclose(np.asarray(img_res), np.asarray(ref_img),
                       rtol=1e-3, atol=1e-5), "img head mismatch vs reference"

    print("KERNEL_OK")
</pallas_src>

<mosaic_0001>
module attributes {stable_mosaic.version = 11 : i64} {
  func.func @decision_kernel(%arg0: memref<24x128xf32, #tpu.memory_space<vmem>>, %arg1: memref<8x128xf32, #tpu.memory_space<vmem>>, %arg2: memref<128x896xbf16, #tpu.memory_space<vmem>>, %arg3: memref<5x256x256xbf16, #tpu.memory_space<vmem>>, %arg4: memref<5x1x256xf32, #tpu.memory_space<vmem>>, %arg5: memref<8x256xf32, #tpu.memory_space<vmem>>) attributes {dimension_semantics = [], scalar_prefetch = 0 : i64, scratch_operands = 0 : i64, tpu.core_type = #tpu.core_type<tc>} {
    %c0 = arith.constant 0 : index
    %c0_0 = arith.constant 0 : index
    %0 = vector.load %arg2[%c0, %c0_0] : memref<128x896xbf16, #tpu.memory_space<vmem>>, vector<128x896xbf16>
    %1 = arith.extf %0 : vector<128x896xbf16> to vector<128x896xf32>
    %c0_1 = arith.constant 0 : index
    %c0_2 = arith.constant 0 : index
    %2 = vector.load %arg0[%c0_1, %c0_2] : memref<24x128xf32, #tpu.memory_space<vmem>>, vector<24x128xf32>
    %3 = vector.extract_strided_slice %1 {offsets = [0, 0], sizes = [128, 640], strides = [1, 1]} : vector<128x896xf32> to vector<128x640xf32>
    %cst = arith.constant dense<0.000000e+00> : vector<24x640xf32>
    %4 = tpu.matmul %2, %3, %cst {dimension_numbers = #tpu.dot_dimension_numbers<[1], [0], [0], [1], [0, 0, 1, 1], [], []>} : vector<24x128xf32>, vector<128x640xf32>, vector<24x640xf32> -> vector<24x640xf32>
    %5 = vector.extract_strided_slice %4 {offsets = [0, 0], sizes = [8, 128], strides = [1, 1]} : vector<24x640xf32> to vector<8x128xf32>
    %6 = vector.extract_strided_slice %1 {offsets = [0, 640], sizes = [128, 128], strides = [1, 1]} : vector<128x896xf32> to vector<128x128xf32>
    %7 = vector.extract_strided_slice %1 {offsets = [0, 768], sizes = [128, 128], strides = [1, 1]} : vector<128x896xf32> to vector<128x128xf32>
    %8 = vector.extract_strided_slice %4 {offsets = [8, 128], sizes = [16, 128], strides = [1, 1]} : vector<24x640xf32> to vector<16x128xf32>
    %9 = vector.extract_strided_slice %4 {offsets = [8, 256], sizes = [16, 128], strides = [1, 1]} : vector<24x640xf32> to vector<16x128xf32>
    %10 = vector.extract_strided_slice %5 {offsets = [0, 0], sizes = [4, 128], strides = [1, 1]} : vector<8x128xf32> to vector<4x128xf32>
    %11 = vector.extract_strided_slice %8 {offsets = [0, 0], sizes = [8, 128], strides = [1, 1]} : vector<16x128xf32> to vector<8x128xf32>
    %cst_3 = arith.constant dense<0.000000e+00> : vector<4x8xf32>
    %12 = tpu.matmul %10, %11, %cst_3 {dimension_numbers = #tpu.dot_dimension_numbers<[1], [1], [0], [0], [0, 0, 1, 0], [], []>} : vector<4x128xf32>, vector<8x128xf32>, vector<4x8xf32> -> vector<4x8xf32>
    %13 = vector.extract_strided_slice %5 {offsets = [4, 0], sizes = [4, 128], strides = [1, 1]} : vector<8x128xf32> to vector<4x128xf32>
    %14 = vector.extract_strided_slice %8 {offsets = [8, 0], sizes = [8, 128], strides = [1, 1]} : vector<16x128xf32> to vector<8x128xf32>
    %cst_4 = arith.constant dense<0.000000e+00> : vector<4x8xf32>
    %15 = tpu.matmul %13, %14, %cst_4 {dimension_numbers = #tpu.dot_dimension_numbers<[1], [1], [0], [0], [0, 0, 1, 0], [], []>} : vector<4x128xf32>, vector<8x128xf32>, vector<4x8xf32> -> vector<4x8xf32>
    %16 = arith.maximumf %12, %15 : vector<4x8xf32>
    %17 = arith.subf %12, %16 : vector<4x8xf32>
    %18 = math.exp %17 : vector<4x8xf32>
    %19 = arith.subf %15, %16 : vector<4x8xf32>
    %20 = math.exp %19 : vector<4x8xf32>
    %21 = arith.addf %18, %20 : vector<4x8xf32>
    %22 = tpu.reciprocal %21 : vector<4x8xf32> -> vector<4x8xf32>
    %23 = arith.mulf %18, %22 : vector<4x8xf32>
    %24 = arith.mulf %20, %22 : vector<4x8xf32>
    %25 = vector.extract_strided_slice %9 {offsets = [0, 0], sizes = [8, 128], strides = [1, 1]} : vector<16x128xf32> to vector<8x128xf32>
    %cst_5 = arith.constant dense<0.000000e+00> : vector<4x128xf32>
    %26 = tpu.matmul %23, %25, %cst_5 {dimension_numbers = #tpu.dot_dimension_numbers<[1], [0], [0], [1], [0, 0, 1, 1], [], []>} : vector<4x8xf32>, vector<8x128xf32>, vector<4x128xf32> -> vector<4x128xf32>
    %27 = vector.extract_strided_slice %9 {offsets = [8, 0], sizes = [8, 128], strides = [1, 1]} : vector<16x128xf32> to vector<8x128xf32>
    %cst_6 = arith.constant dense<0.000000e+00> : vector<4x128xf32>
    %28 = tpu.matmul %24, %27, %cst_6 {dimension_numbers = #tpu.dot_dimension_numbers<[1], [0], [0], [1], [0, 0, 1, 1], [], []>} : vector<4x8xf32>, vector<8x128xf32>, vector<4x128xf32> -> vector<4x128xf32>
    %29 = tpu.concatenate %26, %28 in 0 : vector<4x128xf32>, vector<4x128xf32> -> vector<8x128xf32>
    %cst_7 = arith.constant dense<0.000000e+00> : vector<8x128xf32>
    %30 = tpu.matmul %5, %6, %cst_7 {dimension_numbers = #tpu.dot_dimension_numbers<[1], [0], [0], [1], [0, 0, 1, 1], [], []>} : vector<8x128xf32>, vector<128x128xf32>, vector<8x128xf32> -> vector<8x128xf32>
    %31 = arith.addf %30, %29 : vector<8x128xf32>
    %32 = vector.extract_strided_slice %4 {offsets = [8, 384], sizes = [16, 128], strides = [1, 1]} : vector<24x640xf32> to vector<16x128xf32>
    %33 = vector.extract_strided_slice %4 {offsets = [8, 512], sizes = [16, 128], strides = [1, 1]} : vector<24x640xf32> to vector<16x128xf32>
    %34 = vector.extract_strided_slice %31 {offsets = [0, 0], sizes = [4, 128], strides = [1, 1]} : vector<8x128xf32> to vector<4x128xf32>
    %35 = vector.extract_strided_slice %32 {offsets = [0, 0], sizes = [8, 128], strides = [1, 1]} : vector<16x128xf32> to vector<8x128xf32>
    %cst_8 = arith.constant dense<0.000000e+00> : vector<4x8xf32>
    %36 = tpu.matmul %34, %35, %cst_8 {dimension_numbers = #tpu.dot_dimension_numbers<[1], [1], [0], [0], [0, 0, 1, 0], [], []>} : vector<4x128xf32>, vector<8x128xf32>, vector<4x8xf32> -> vector<4x8xf32>
    %37 = vector.extract_strided_slice %31 {offsets = [4, 0], sizes = [4, 128], strides = [1, 1]} : vector<8x128xf32> to vector<4x128xf32>
    %38 = vector.extract_strided_slice %32 {offsets = [8, 0], sizes = [8, 128], strides = [1, 1]} : vector<16x128xf32> to vector<8x128xf32>
    %cst_9 = arith.constant dense<0.000000e+00> : vector<4x8xf32>
    %39 = tpu.matmul %37, %38, %cst_9 {dimension_numbers = #tpu.dot_dimension_numbers<[1], [1], [0], [0], [0, 0, 1, 0], [], []>} : vector<4x128xf32>, vector<8x128xf32>, vector<4x8xf32> -> vector<4x8xf32>
    %40 = arith.maximumf %36, %39 : vector<4x8xf32>
    %41 = arith.subf %36, %40 : vector<4x8xf32>
    %42 = math.exp %41 : vector<4x8xf32>
    %43 = arith.subf %39, %40 : vector<4x8xf32>
    %44 = math.exp %43 : vector<4x8xf32>
    %45 = arith.addf %42, %44 : vector<4x8xf32>
    %46 = tpu.reciprocal %45 : vector<4x8xf32> -> vector<4x8xf32>
    %47 = arith.mulf %42, %46 : vector<4x8xf32>
    %48 = arith.mulf %44, %46 : vector<4x8xf32>
    %49 = vector.extract_strided_slice %33 {offsets = [0, 0], sizes = [8, 128], strides = [1, 1]} : vector<16x128xf32> to vector<8x128xf32>
    %cst_10 = arith.constant dense<0.000000e+00> : vector<4x128xf32>
    %50 = tpu.matmul %47, %49, %cst_10 {dimension_numbers = #tpu.dot_dimension_numbers<[1], [0], [0], [1], [0, 0, 1, 1], [], []>} : vector<4x8xf32>, vector<8x128xf32>, vector<4x128xf32> -> vector<4x128xf32>
    %51 = vector.extract_strided_slice %33 {offsets = [8, 0], sizes = [8, 128], strides = [1, 1]} : vector<16x128xf32> to vector<8x128xf32>
    %cst_11 = arith.constant dense<0.000000e+00> : vector<4x128xf32>
    %52 = tpu.matmul %48, %51, %cst_11 {dimension_numbers = #tpu.dot_dimension_numbers<[1], [0], [0], [1], [0, 0, 1, 1], [], []>} : vector<4x8xf32>, vector<8x128xf32>, vector<4x128xf32> -> vector<4x128xf32>
    %53 = tpu.concatenate %50, %52 in 0 : vector<4x128xf32>, vector<4x128xf32> -> vector<8x128xf32>
    %cst_12 = arith.constant dense<0.000000e+00> : vector<8x128xf32>
    %54 = tpu.matmul %31, %6, %cst_12 {dimension_numbers = #tpu.dot_dimension_numbers<[1], [0], [0], [1], [0, 0, 1, 1], [], []>} : vector<8x128xf32>, vector<128x128xf32>, vector<8x128xf32> -> vector<8x128xf32>
    %55 = arith.addf %54, %53 : vector<8x128xf32>
    %cst_13 = arith.constant dense<0.000000e+00> : vector<8x128xf32>
    %56 = tpu.matmul %55, %7, %cst_13 {dimension_numbers = #tpu.dot_dimension_numbers<[1], [0], [0], [1], [0, 0, 1, 1], [], []>} : vector<8x128xf32>, vector<128x128xf32>, vector<8x128xf32> -> vector<8x128xf32>
    %57 = vector.extract_strided_slice %56 {offsets = [0, 0], sizes = [4, 128], strides = [1, 1]} : vector<8x128xf32> to vector<4x128xf32>
    %58 = vector.extract_strided_slice %56 {offsets = [4, 0], sizes = [4, 128], strides = [1, 1]} : vector<8x128xf32> to vector<4x128xf32>
    %59 = arith.maximumf %57, %58 : vector<4x128xf32>
    %60 = arith.subf %57, %59 : vector<4x128xf32>
    %61 = math.exp %60 : vector<4x128xf32>
    %62 = arith.subf %58, %59 : vector<4x128xf32>
    %63 = math.exp %62 : vector<4x128xf32>
    %64 = arith.addf %61, %63 : vector<4x128xf32>
    %65 = tpu.reciprocal %64 : vector<4x128xf32> -> vector<4x128xf32>
    %66 = arith.mulf %61, %65 : vector<4x128xf32>
    %67 = arith.mulf %63, %65 : vector<4x128xf32>
    %68 = tpu.concatenate %66, %67 in 0 : vector<4x128xf32>, vector<4x128xf32> -> vector<8x128xf32>
    %c0_14 = arith.constant 0 : index
    %c0_15 = arith.constant 0 : index
    %69 = vector.load %arg1[%c0_14, %c0_15] : memref<8x128xf32, #tpu.memory_space<vmem>>, vector<8x128xf32>
    %70 = tpu.concatenate %68, %69 in 1 : vector<8x128xf32>, vector<8x128xf32> -> vector<8x256xf32>
    %c0_16 = arith.constant 0 : index
    %c0_17 = arith.constant 0 : index
    %c0_18 = arith.constant 0 : index
    %71 = vector.load %arg3[%c0_16, %c0_17, %c0_18] : memref<5x256x256xbf16, #tpu.memory_space<vmem>>, vector<1x256x256xbf16>
    %72 = vector.shape_cast %71 : vector<1x256x256xbf16> to vector<256x256xbf16>
    %73 = arith.extf %72 : vector<256x256xbf16> to vector<256x256xf32>
    %c0_19 = arith.constant 0 : index
    %c0_20 = arith.constant 0 : index
    %c0_21 = arith.constant 0 : index
    %74 = vector.load %arg4[%c0_19, %c0_20, %c0_21] : memref<5x1x256xf32, #tpu.memory_space<vmem>>, vector<1x1x256xf32>
    %75 = vector.shape_cast %74 : vector<1x1x256xf32> to vector<1x256xf32>
    %cst_22 = arith.constant dense<0.000000e+00> : vector<8x256xf32>
    %76 = tpu.matmul %70, %73, %cst_22 {dimension_numbers = #tpu.dot_dimension_numbers<[1], [0], [0], [1], [0, 0, 1, 1], [], []>} : vector<8x256xf32>, vector<256x256xf32>, vector<8x256xf32> -> vector<8x256xf32>
    %77 = vector.broadcast %75 : vector<1x256xf32> to vector<8x256xf32>
    %78 = arith.addf %76, %77 : vector<8x256xf32>
    %cst_23 = arith.constant 0.000000e+00 : f32
    %79 = vector.broadcast %cst_23 : f32 to vector<8x256xf32>
    %80 = arith.maximumf %78, %79 : vector<8x256xf32>
    %c1 = arith.constant 1 : index
    %c0_24 = arith.constant 0 : index
    %c0_25 = arith.constant 0 : index
    %81 = vector.load %arg3[%c1, %c0_24, %c0_25] : memref<5x256x256xbf16, #tpu.memory_space<vmem>>, vector<1x256x256xbf16>
    %82 = vector.shape_cast %81 : vector<1x256x256xbf16> to vector<256x256xbf16>
    %83 = arith.extf %82 : vector<256x256xbf16> to vector<256x256xf32>
    %c1_26 = arith.constant 1 : index
    %c0_27 = arith.constant 0 : index
    %c0_28 = arith.constant 0 : index
    %84 = vector.load %arg4[%c1_26, %c0_27, %c0_28] : memref<5x1x256xf32, #tpu.memory_space<vmem>>, vector<1x1x256xf32>
    %85 = vector.shape_cast %84 : vector<1x1x256xf32> to vector<1x256xf32>
    %cst_29 = arith.constant dense<0.000000e+00> : vector<8x256xf32>
    %86 = tpu.matmul %80, %83, %cst_29 {dimension_numbers = #tpu.dot_dimension_numbers<[1], [0], [0], [1], [0, 0, 1, 1], [], []>} : vector<8x256xf32>, vector<256x256xf32>, vector<8x256xf32> -> vector<8x256xf32>
    %87 = vector.broadcast %85 : vector<1x256xf32> to vector<8x256xf32>
    %88 = arith.addf %86, %87 : vector<8x256xf32>
    %cst_30 = arith.constant 0.000000e+00 : f32
    %89 = vector.broadcast %cst_30 : f32 to vector<8x256xf32>
    %90 = arith.maximumf %88, %89 : vector<8x256xf32>
    %c2 = arith.constant 2 : index
    %c0_31 = arith.constant 0 : index
    %c0_32 = arith.constant 0 : index
    %91 = vector.load %arg3[%c2, %c0_31, %c0_32] : memref<5x256x256xbf16, #tpu.memory_space<vmem>>, vector<1x256x256xbf16>
    %92 = vector.shape_cast %91 : vector<1x256x256xbf16> to vector<256x256xbf16>
    %93 = arith.extf %92 : vector<256x256xbf16> to vector<256x256xf32>
    %c2_33 = arith.constant 2 : index
    %c0_34 = arith.constant 0 : index
    %c0_35 = arith.constant 0 : index
    %94 = vector.load %arg4[%c2_33, %c0_34, %c0_35] : memref<5x1x256xf32, #tpu.memory_space<vmem>>, vector<1x1x256xf32>
    %95 = vector.shape_cast %94 : vector<1x1x256xf32> to vector<1x256xf32>
    %cst_36 = arith.constant dense<0.000000e+00> : vector<8x256xf32>
    %96 = tpu.matmul %90, %93, %cst_36 {dimension_numbers = #tpu.dot_dimension_numbers<[1], [0], [0], [1], [0, 0, 1, 1], [], []>} : vector<8x256xf32>, vector<256x256xf32>, vector<8x256xf32> -> vector<8x256xf32>
    %97 = vector.broadcast %95 : vector<1x256xf32> to vector<8x256xf32>
    %98 = arith.addf %96, %97 : vector<8x256xf32>
    %cst_37 = arith.constant 0.000000e+00 : f32
    %99 = vector.broadcast %cst_37 : f32 to vector<8x256xf32>
    %100 = arith.maximumf %98, %99 : vector<8x256xf32>
    %c3 = arith.constant 3 : index
    %c0_38 = arith.constant 0 : index
    %c0_39 = arith.constant 0 : index
    %101 = vector.load %arg3[%c3, %c0_38, %c0_39] : memref<5x256x256xbf16, #tpu.memory_space<vmem>>, vector<1x256x256xbf16>
    %102 = vector.shape_cast %101 : vector<1x256x256xbf16> to vector<256x256xbf16>
    %103 = arith.extf %102 : vector<256x256xbf16> to vector<256x256xf32>
    %c3_40 = arith.constant 3 : index
    %c0_41 = arith.constant 0 : index
    %c0_42 = arith.constant 0 : index
    %104 = vector.load %arg4[%c3_40, %c0_41, %c0_42] : memref<5x1x256xf32, #tpu.memory_space<vmem>>, vector<1x1x256xf32>
    %105 = vector.shape_cast %104 : vector<1x1x256xf32> to vector<1x256xf32>
    %cst_43 = arith.constant dense<0.000000e+00> : vector<8x256xf32>
    %106 = tpu.matmul %100, %103, %cst_43 {dimension_numbers = #tpu.dot_dimension_numbers<[1], [0], [0], [1], [0, 0, 1, 1], [], []>} : vector<8x256xf32>, vector<256x256xf32>, vector<8x256xf32> -> vector<8x256xf32>
    %107 = vector.broadcast %105 : vector<1x256xf32> to vector<8x256xf32>
    %108 = arith.addf %106, %107 : vector<8x256xf32>
    %cst_44 = arith.constant 0.000000e+00 : f32
    %109 = vector.broadcast %cst_44 : f32 to vector<8x256xf32>
    %110 = arith.maximumf %108, %109 : vector<8x256xf32>
    %c4 = arith.constant 4 : index
    %c0_45 = arith.constant 0 : index
    %c0_46 = arith.constant 0 : index
    %111 = vector.load %arg3[%c4, %c0_45, %c0_46] : memref<5x256x256xbf16, #tpu.memory_space<vmem>>, vector<1x256x256xbf16>
    %112 = vector.shape_cast %111 : vector<1x256x256xbf16> to vector<256x256xbf16>
    %113 = arith.extf %112 : vector<256x256xbf16> to vector<256x256xf32>
    %c4_47 = arith.constant 4 : index
    %c0_48 = arith.constant 0 : index
    %c0_49 = arith.constant 0 : index
    %114 = vector.load %arg4[%c4_47, %c0_48, %c0_49] : memref<5x1x256xf32, #tpu.memory_space<vmem>>, vector<1x1x256xf32>
    %115 = vector.shape_cast %114 : vector<1x1x256xf32> to vector<1x256xf32>
    %cst_50 = arith.constant dense<0.000000e+00> : vector<8x256xf32>
    %116 = tpu.matmul %110, %113, %cst_50 {dimension_numbers = #tpu.dot_dimension_numbers<[1], [0], [0], [1], [0, 0, 1, 1], [], []>} : vector<8x256xf32>, vector<256x256xf32>, vector<8x256xf32> -> vector<8x256xf32>
    %117 = vector.broadcast %115 : vector<1x256xf32> to vector<8x256xf32>
    %118 = arith.addf %116, %117 : vector<8x256xf32>
    %c0_51 = arith.constant 0 : index
    %c0_52 = arith.constant 0 : index
    %119 = vector.load %arg5[%c0_51, %c0_52] : memref<8x256xf32, #tpu.memory_space<vmem>>, vector<8x256xf32>
    tpu.vector_store %arg5[%c0_51, %c0_52], %118 {strides = array<i32>} : memref<8x256xf32, #tpu.memory_space<vmem>>, vector<8x256xf32>,
    return
  }
}

</mosaic_0001>

<bundles_post_ra>
// kernel: forward.1
= control target key start
LH: loop header
LB: loop body
LE: loop exit
PB: predicated region body
PF: predicated region fallthrough
CT: control target
= control target key end

     0   :  { %10 = vsyncpa [#allocation3], 0  ;;  %s2941_s0 = inlined_call_operand.vmem [shape: f32[24,128], index: 0, kind: input, shape index: {}]   ;;  %s2942_s1 = inlined_call_operand.vmem [shape: f32[8,128], index: 1, kind: input, shape index: {}]   ;;  %s2943_s2 = inlined_call_operand.hbm [shape: bf16[128,896], index: 2, kind: input, shape index: {}]   ;;  %s2944_s3 = inlined_call_operand.hbm [shape: bf16[5,256,256], index: 3, kind: input, shape index: {}]   ;;  %s2945_s4 = inlined_call_operand.vmem [shape: f32[5,1,256], index: 4, kind: input, shape index: {}]   ;;  %s2946_s5 = inlined_call_operand.vmem [shape: f32[8,256], index: 5, kind: output, shape index: {}]  }
   0x1   :  { %11 = vsyncpa [#allocation5], 0  ;;  %s2581_s18 = smov [#allocation2]  }
   0x2   :  { %s21_s19 = sshll.u32 %s2581_s18, 4  ;;  %s22_s19 = int_to_ptr.vmem [resolvable:$true] %s21_s19 }
   0x3   :  { %s2545_s20 = scalar_lea.vmem %s22_s19, 7168  ;;  %p2550_p1 = scmp.lt.s32.totalorder %s22_s19, %s22_s19 }
   0x4   :  { %p2546_p0 = scmp.ne.s32.totalorder %s22_s19, %s2545_s20  ;;  %p2551_p2 = scmp.lt.s32.totalorder %s2545_s20, %s2545_s20 }
   0x6   :  { %p2552_p3 = por %p2551_p2, %p2550_p1 }
   0x8   :  { %p2553_p4 = pnand %p2552_p3, %p2546_p0 }
   0xa   :  { %2556 = shalt.err (!%p2553_p4)
}
   0xb   :  { %s2582_s21 = smov 448   ;;  %s2583_s22 = smov 28  }
   0xc   :  { %27 = dma.hbm_to_vmem [thread:$0]  %s2943_s2, 7168, %s22_s19, [#allocation3], %s2582_s21, %s2582_s21, %s2583_s22  }
   0xd   :  { %s2584_s25 = smov [#allocation4]  }
   0xe   :  { %s33_s26 = sshll.u32 %s2584_s25, 4  ;;  %s34_s26 = int_to_ptr.vmem [resolvable:$true] %s33_s26 }
   0xf   :  { %s2565_s27 = scalar_lea.vmem %s34_s26, 20480  ;;  %p2570_p6 = scmp.lt.s32.totalorder %s34_s26, %s34_s26 }
  0x10   :  { %p2566_p5 = scmp.ne.s32.totalorder %s34_s26, %s2565_s27  ;;  %p2571_p7 = scmp.lt.s32.totalorder %s2565_s27, %s2565_s27 }
  0x12   :  { %p2572_p8 = por %p2571_p7, %p2570_p6 }
  0x14   :  { %p2573_p9 = pnand %p2572_p8, %p2566_p5 }
  0x16   :  { %2576 = shalt.err (!%p2573_p9)
}
  0x17   :  { %s2585_s28 = smov 128   ;;  %s2586_s29 = smov 8  }
  0x18   :  { %39 = dma.hbm_to_vmem [thread:$0]  %s2944_s3, 20480, %s34_s26, [#allocation5], %s2585_s28, %s2585_s28, %s2586_s29  }
  0x19   :  { %2577 = dma.done.wait [#allocation3], 7168  }
  0x1a   :  { %2578 = vsyncadd [#allocation3], 4294960128 }
  0x1b   :  { %2579 = dma.done.wait [#allocation5], 20480  }
  0x1c   :  { %2580 = vsyncadd [#allocation5], 4294946816  ;;  %v2587_v0 = vmov 0.0   ;;  %v108_v1 = vld [vmem:[#allocation2 + $0x1a4] sm:$0xff]  ;;  %v100_v3 = vld [vmem:[#allocation2 + $0x16c] sm:$0xff]  ;;  %vm2588_vm0 = vmmov 0  }
  0x1d   :  { %291 = vmatprep.mubr.f32.mxu1 %v2587_v0  ;;  %2325 = vmatprep.subr.mxu0 %v2587_v0  ;;  %v104_v2 = vld [vmem:[#allocation2 + $0x188] sm:$0xff]  ;;  %v218_v4 = vunpack.c.h.bf16 %v108_v1  ;;  %v217_v5 = vunpack.c.l.bf16 %v108_v1  ;;  %v96_v8 = vld [vmem:[#allocation2 + $0x150] sm:$0xff]  ;;  %v204_v9 = vunpack.c.h.bf16 %v100_v3  ;;  %v203_v10 = vunpack.c.l.bf16 %v100_v3  ;;  %v88_v14 = vld [vmem:[#allocation2 + $0x118] sm:$0xff] }
  0x1e   :  { %v211_v6 = vunpack.c.h.bf16 %v104_v2  ;;  %v210_v7 = vunpack.c.l.bf16 %v104_v2  ;;  %v92_v11 = vld [vmem:[#allocation2 + $0x134] sm:$0xff]  ;;  %v197_v12 = vunpack.c.h.bf16 %v96_v8  ;;  %v196_v13 = vunpack.c.l.bf16 %v96_v8  ;;  %v84_v17 = vld [vmem:[#allocation2 + $0xfc] sm:$0xff]  ;;  %v76_v23 = vld [vmem:[#allocation2 + $0xc4] sm:$0xff]  ;;  %2357 = vmatprep.mubr.msk.f32.mxu0 %vm2588_vm0, %v2587_v0 }
  0x1f   :  { %227 = vmatprep.subr.mxu1 %v218_v4  ;;  %v190_v15 = vunpack.c.h.bf16 %v92_v11  ;;  %v189_v16 = vunpack.c.l.bf16 %v92_v11  ;;  %v183_v18 = vunpack.c.h.bf16 %v88_v14  ;;  %v182_v19 = vunpack.c.l.bf16 %v88_v14  ;;  %v80_v20 = vld [vmem:[#allocation2 + $0xe0] sm:$0xff]  ;;  %v72_v26 = vld [vmem:[#allocation2 + $0xa8] sm:$0xff]  ;;  %v64_v32 = vld [vmem:[#allocation2 + $0x70] sm:$0xff] }
  0x20   :  { %228 = vmatpush1.msra.mxu1 %v217_v5  ;;  %v176_v21 = vunpack.c.h.bf16 %v84_v17  ;;  %v175_v22 = vunpack.c.l.bf16 %v84_v17  ;;  %v169_v24 = vunpack.c.h.bf16 %v80_v20  ;;  %v168_v25 = vunpack.c.l.bf16 %v80_v20  ;;  %v68_v29 = vld [vmem:[#allocation2 + $0x8c] sm:$0xff]  ;;  %v60_v35 = vld [vmem:[#allocation2 + $0x54] sm:$0xff]  ;;  %v52_v41 = vld [vmem:[#allocation2 + $0x1c] sm:$0xff] }
  0x21   :  { %229 = vmatprep.subr.mxu1 %v211_v6  ;;  %v162_v27 = vunpack.c.h.bf16 %v76_v23  ;;  %v161_v28 = vunpack.c.l.bf16 %v76_v23  ;;  %v155_v30 = vunpack.c.h.bf16 %v72_v26  ;;  %v154_v31 = vunpack.c.l.bf16 %v72_v26  ;;  %v56_v38 = vld [vmem:[#allocation2 + $0x38] sm:$0xff]  ;;  %v48_v44 = vld [vmem:[#allocation2] sm:$0xff]  ;;  %v109_v47 = vld [vmem:[#allocation2 + $0x1ac] sm:$0xff] }
  0x22   :  { %230 = vmatpush1.msra.mxu1 %v210_v7  ;;  %v148_v33 = vunpack.c.h.bf16 %v68_v29  ;;  %v147_v34 = vunpack.c.l.bf16 %v68_v29  ;;  %v141_v36 = vunpack.c.h.bf16 %v64_v32  ;;  %v140_v37 = vunpack.c.l.bf16 %v64_v32  ;;  %v105_v50 = vld [vmem:[#allocation2 + $0x190] sm:$0xff]  ;;  %v2630_v52 = vld [vmem:[%s2941_s0] sm:$0xff]  ;;  %v97_v57 = vld [vmem:[#allocation2 + $0x158] sm:$0xff] }
  0x23   :  { %231 = vmatprep.subr.mxu1 %v204_v9  ;;  %v134_v39 = vunpack.c.h.bf16 %v60_v35  ;;  %v133_v40 = vunpack.c.l.bf16 %v60_v35  ;;  %v127_v42 = vunpack.c.h.bf16 %v56_v38  ;;  %v126_v43 = vunpack.c.l.bf16 %v56_v38  ;;  %v101_v54 = vld [vmem:[#allocation2 + $0x174] sm:$0xff]  ;;  %v2637_v59 = vld [vmem:[%s2941_s0 + $0x8] sm:$0xff]  ;;  %v93_v61 = vld [vmem:[#allocation2 + $0x13c] sm:$0xff] }
  0x24   :  { %232 = vmatpush1.msra.mxu1 %v203_v10  ;;  %v120_v45 = vunpack.c.h.bf16 %v52_v41  ;;  %v119_v46 = vunpack.c.l.bf16 %v52_v41  ;;  %v113_v48 = vunpack.c.h.bf16 %v48_v44  ;;  %v112_v49 = vunpack.c.l.bf16 %v48_v44  ;;  %v89_v1 = vld [vmem:[#allocation2 + $0x120] sm:$0xff]  ;;  %v2644_v3 = vld [vmem:[%s2941_s0 + $0x10] sm:$0xff]  ;;  %v81_v8 = vld [vmem:[#allocation2 + $0xe8] sm:$0xff] }
  0x25   :  { %233 = vmatprep.subr.mxu1 %v197_v12  ;;  %v220_v51 = vunpack.c.h.bf16 %v109_v47  ;;  %v219_v53 = vunpack.c.l.bf16 %v109_v47  ;;  %v213_v55 = vunpack.c.h.bf16 %v105_v50  ;;  %v212_v56 = vunpack.c.l.bf16 %v105_v50  ;;  %v85_v5 = vld [vmem:[#allocation2 + $0x104] sm:$0xff]  ;;  %v77_v11 = vld [vmem:[#allocation2 + $0xcc] sm:$0xff]  ;;  %v69_v17 = vld [vmem:[#allocation2 + $0x94] sm:$0xff] }
  0x26   :  { %234 = vmatpush1.msra.mxu1 %v196_v13  ;;  %v206_v58 = vunpack.c.h.bf16 %v101_v54  ;;  %v205_v60 = vunpack.c.l.bf16 %v101_v54  ;;  %v199_v62 = vunpack.c.h.bf16 %v97_v57  ;;  %v198_v63 = vunpack.c.l.bf16 %v97_v57  ;;  %v73_v14 = vld [vmem:[#allocation2 + $0xb0] sm:$0xff]  ;;  %v65_v20 = vld [vmem:[#allocation2 + $0x78] sm:$0xff]  ;;  %v57_v26 = vld [vmem:[#allocation2 + $0x40] sm:$0xff] }
  0x27   :  { %235 = vmatprep.subr.mxu1 %v190_v15  ;;  %v192_v2 = vunpack.c.h.bf16 %v93_v61  ;;  %v191_v4 = vunpack.c.l.bf16 %v93_v61  ;;  %v185_v6 = vunpack.c.h.bf16 %v89_v1  ;;  %v184_v7 = vunpack.c.l.bf16 %v89_v1  ;;  %v61_v23 = vld [vmem:[#allocation2 + $0x5c] sm:$0xff]  ;;  %v53_v29 = vld [vmem:[#allocation2 + $0x24] sm:$0xff]  ;;  %v2682_v50 = vld [vmem:[#allocation2 + $0xf0] sm:$0xff] }
  0x28   :  { %236 = vmatpush1.msra.mxu1 %v189_v16  ;;  %v178_v9 = vunpack.c.h.bf16 %v85_v5  ;;  %v177_v10 = vunpack.c.l.bf16 %v85_v5  ;;  %v171_v12 = vunpack.c.h.bf16 %v81_v8  ;;  %v170_v13 = vunpack.c.l.bf16 %v81_v8  ;;  %v49_v32 = vld [vmem:[#allocation2 + $0x8] sm:$0xff]  ;;  %v2660_v38 = vld [vmem:[#allocation2 + $0x198] sm:$0xff]  ;;  %v2701_v61 = vld [vmem:[#allocation2 + $0x80] sm:$0xff] }
  0x29   :  { %237 = vmatprep.subr.mxu1 %v183_v18  ;;  %v164_v15 = vunpack.c.h.bf16 %v77_v11  ;;  %v163_v16 = vunpack.c.l.bf16 %v77_v11  ;;  %v157_v18 = vunpack.c.h.bf16 %v73_v14  ;;  %v115_v35 = vunpack.c.h.bf16 %v49_v32  ;;  %v2670_v44 = vld [vmem:[#allocation2 + $0x144] sm:$0xff]  ;;  %v2713_v5 = vld [vmem:[#allocation2 + $0x2c] sm:$0xff] }
  0x2a   :  { %238 = vmatpush1.msra.mxu1 %v182_v19  ;;  %v156_v19 = vunpack.c.l.bf16 %v73_v14  ;;  %v214_v41 = vunpack.c.l.bf16 %v2660_v38  ;;  %v193_v47 = vunpack.c.l.bf16 %v2670_v44  ;;  %v172_v54 = vunpack.c.l.bf16 %v2682_v50 }
  0x2b   :  { %239 = vmatprep.subr.mxu1 %v176_v21  ;;  %v150_v21 = vunpack.c.h.bf16 %v69_v17  ;;  %vm621_vm1 = vcmask 64512   ;;  %vm771_vm2 = vcmask 1043456  }
  0x2c   :  { %240 = vmatpush1.msra.mxu1 %v175_v22  ;;  %v149_v22 = vunpack.c.l.bf16 %v69_v17 }
  0x2d   :  { %241 = vmatprep.subr.mxu1 %v169_v24  ;;  %v143_v24 = vunpack.c.h.bf16 %v65_v20 }
  0x2e   :  { %242 = vmatpush1.msra.mxu1 %v168_v25  ;;  %v142_v25 = vunpack.c.l.bf16 %v65_v20 }
  0x2f   :  { %243 = vmatprep.subr.mxu1 %v162_v27  ;;  %v136_v27 = vunpack.c.h.bf16 %v61_v23 }
  0x30   :  { %244 = vmatpush1.msra.mxu1 %v161_v28  ;;  %v135_v28 = vunpack.c.l.bf16 %v61_v23 }
  0x31   :  { %245 = vmatprep.subr.mxu1 %v155_v30  ;;  %v129_v30 = vunpack.c.h.bf16 %v57_v26 }
  0x32   :  { %246 = vmatpush1.msra.mxu1 %v154_v31  ;;  %v128_v31 = vunpack.c.l.bf16 %v57_v26 }
  0x33   :  { %247 = vmatprep.subr.mxu1 %v148_v33  ;;  %v122_v33 = vunpack.c.h.bf16 %v53_v29 }
  0x34   :  { %248 = vmatpush1.msra.mxu1 %v147_v34  ;;  %v121_v34 = vunpack.c.l.bf16 %v53_v29 }
  0x35   :  { %249 = vmatprep.subr.mxu1 %v141_v36  ;;  %v114_v36 = vunpack.c.l.bf16 %v49_v32 }
  0x36   :  { %250 = vmatpush1.msra.mxu1 %v140_v37  ;;  %v2658_v37 = vld [vmem:[#allocation2 + $0x1b4] sm:$0xff] }
  0x37   :  { %251 = vmatprep.subr.mxu1 %v134_v39  ;;  %v2662_v39 = vld [vmem:[#allocation2 + $0x17c] sm:$0xff] }
  0x38   :  { %252 = vmatpush1.msra.mxu1 %v133_v40  ;;  %v221_v40 = vunpack.c.l.bf16 %v2658_v37 }
  0x39   :  { %253 = vmatprep.subr.mxu1 %v127_v42  ;;  %v2666_v42 = vld [vmem:[#allocation2 + $0x160] sm:$0xff] }
  0x3a   :  { %254 = vmatpush1.msra.mxu1 %v126_v43  ;;  %2326 = vmatpush3.msra.mxu0 %v221_v40  ;;  %v207_v43 = vunpack.c.l.bf16 %v2662_v39  ;;  %v215_v40 = vunpack.c.h.bf16 %v2660_v38 }
  0x3b   :  { %255 = vmatprep.subr.mxu1 %v120_v45  ;;  %2327 = vmatprep.subr.mxu0 %v2587_v0  ;;  %v200_v45 = vunpack.c.l.bf16 %v2666_v42 }
  0x3c   :  { %256 = vmatpush1.msra.mxu1 %v119_v46  ;;  %2328 = vmatpush3.msra.mxu0 %v214_v41  ;;  %v2674_v46 = vld [vmem:[#allocation2 + $0x128] sm:$0xff]  ;;  %v208_v41 = vunpack.c.h.bf16 %v2662_v39 }
  0x3d   :  { %257 = vmatprep.subr.mxu1 %v113_v48  ;;  %2329 = vmatprep.subr.mxu0 %v2587_v0  ;;  %v2678_v48 = vld [vmem:[#allocation2 + $0x10c] sm:$0xff] }
  0x3e   :  { %258 = vmatpush1.msra.mxu1 %v112_v49  ;;  %2330 = vmatpush3.msra.mxu0 %v207_v43  ;;  %v186_v49 = vunpack.c.l.bf16 %v2674_v46  ;;  %v201_v43 = vunpack.c.h.bf16 %v2666_v42  ;;  %v103_v42 = vld [vmem:[#allocation2 + $0x168] ss:$28 sps:$4 sm:$0xff]  }
  0x3f   :  { %292 = vmatmul.mubr.f32.vlgmr.msra.gmra.mxu1 %v2630_v52  ;;  %307 = vmatprep.subr.mxu1 %v220_v51  ;;  %v179_v51 = vunpack.c.l.bf16 %v2678_v48 }
  0x40   :  { %296 = vmatprep.mubr.f32.mxu1 %v2587_v0  ;;  %308 = vmatpush1.msra.mxu1 %v219_v53  ;;  %v2686_v53 = vld [vmem:[#allocation2 + $0xd4] sm:$0xff] }
  0x41   :  { %309 = vmatprep.subr.mxu1 %v213_v55  ;;  %2331 = vmatprep.subr.mxu0 %v2587_v0  ;;  %v165_v55 = vunpack.c.l.bf16 %v2686_v53 }
  0x42   :  { %310 = vmatpush1.msra.mxu1 %v212_v56  ;;  %2332 = vmatpush3.msra.mxu0 %v200_v45  ;;  %v2693_v56 = vld [vmem:[#allocation2 + $0xb8] sm:$0xff]  ;;  %v194_v45 = vunpack.c.h.bf16 %v2670_v44  ;;  %v209_v44 = vunpack.c.h.bf16 %v103_v42 }
  0x43   :  { %297 = vmatmul.mubr.f32.gmra.mxu1 %v2637_v59  ;;  %311 = vmatprep.subr.mxu1 %v206_v58  ;;  %v158_v57 = vunpack.c.l.bf16 %v2693_v56  ;;  %v2697_v58 = vld [vmem:[#allocation2 + $0x9c] sm:$0xff] }
  0x44   :  { %301 = vmatprep.mubr.f32.mxu1 %v2587_v0  ;;  %312 = vmatpush1.msra.mxu1 %v205_v60  ;;  %v151_v60 = vunpack.c.l.bf16 %v2697_v58 }
  0x45   :  { %313 = vmatprep.subr.mxu1 %v199_v62  ;;  %2333 = vmatprep.subr.mxu0 %v2587_v0  ;;  %v144_v62 = vunpack.c.l.bf16 %v2701_v61 }
  0x46   :  { %314 = vmatpush1.msra.mxu1 %v198_v63  ;;  %2334 = vmatpush3.msra.mxu0 %v193_v47  ;;  %v2705_v63 = vld [vmem:[#allocation2 + $0x64] sm:$0xff]  ;;  %v187_v47 = vunpack.c.h.bf16 %v2674_v46  ;;  %v95_v46 = vld [vmem:[#allocation2 + $0x130] ss:$28 sps:$4 sm:$0xff]  }
  0x47   :  { %302 = vmatmul.mubr.f32.gmra.mxu1 %v2644_v3  ;;  %315 = vmatprep.subr.mxu1 %v192_v2  ;;  %v137_v1 = vunpack.c.l.bf16 %v2705_v63  ;;  %v2709_v2 = vld [vmem:[#allocation2 + $0x48] sm:$0xff] }
  0x48   :  { %316 = vmatpush1.msra.mxu1 %v191_v4  ;;  %371 = vmatprep.mubr.f32.mxu1 %v2587_v0  ;;  %v130_v4 = vunpack.c.l.bf16 %v2709_v2 }
  0x49   :  { %317 = vmatprep.subr.mxu1 %v185_v6  ;;  %2335 = vmatprep.subr.mxu0 %v2587_v0  ;;  %v2715_v6 = vld [vmem:[#allocation2 + $0x10] sm:$0xff] }
  0x4a   :  { %318 = vmatpush1.msra.mxu1 %v184_v7  ;;  %2336 = vmatpush3.msra.mxu0 %v186_v49  ;;  %v123_v7 = vunpack.c.l.bf16 %v2713_v5  ;;  %v116_v8 = vunpack.c.l.bf16 %v2715_v6  ;;  %v180_v49 = vunpack.c.h.bf16 %v2678_v48  ;;  %v202_v48 = vunpack.c.l.bf16 %v103_v42 }
  0x4b   :  { %319 = vmatprep.subr.mxu1 %v178_v9  ;;  %2337 = vmatprep.subr.mxu0 %v2587_v0 }
  0x4c   :  { %320 = vmatpush1.msra.mxu1 %v177_v10  ;;  %2338 = vmatpush3.msra.mxu0 %v179_v51  ;;  %v173_v51 = vunpack.c.h.bf16 %v2682_v50  ;;  %v195_v50 = vunpack.c.h.bf16 %v95_v46 }
  0x4d   :  { %321 = vmatprep.subr.mxu1 %v171_v12  ;;  %2339 = vmatprep.subr.mxu0 %v2587_v0 }
  0x4e   :  { %322 = vmatpush1.msra.mxu1 %v170_v13  ;;  %2340 = vmatpush3.msra.mxu0 %v172_v54  ;;  %v166_v54 = vunpack.c.h.bf16 %v2686_v53  ;;  %v87_v53 = vld [vmem:[#allocation2 + $0xf8] ss:$28 sps:$4 sm:$0xff]  }
  0x4f   :  { %323 = vmatprep.subr.mxu1 %v164_v15  ;;  %2341 = vmatprep.subr.mxu0 %v2587_v0 }
  0x50   :  { %324 = vmatpush1.msra.mxu1 %v163_v16  ;;  %2342 = vmatpush3.msra.mxu0 %v165_v55  ;;  %v159_v55 = vunpack.c.h.bf16 %v2693_v56  ;;  %v188_v56 = vunpack.c.l.bf16 %v95_v46  ;;  %v1315_v46 = vld [vmem:[#allocation4 + $0x18] sm:$0xff] }
  0x51   :  { %325 = vmatprep.subr.mxu1 %v157_v18  ;;  %2343 = vmatprep.subr.mxu0 %v2587_v0 }
  0x52   :  { %326 = vmatpush1.msra.mxu1 %v156_v19  ;;  %2344 = vmatpush3.msra.mxu0 %v158_v57  ;;  %v152_v57 = vunpack.c.h.bf16 %v2697_v58  ;;  %v181_v58 = vunpack.c.h.bf16 %v87_v53 }
  0x53   :  { %327 = vmatprep.subr.mxu1 %v150_v21  ;;  %2345 = vmatprep.subr.mxu0 %v2587_v0 }
  0x54   :  { %328 = vmatpush1.msra.mxu1 %v149_v22  ;;  %2346 = vmatpush3.msra.mxu0 %v151_v60  ;;  %v145_v60 = vunpack.c.h.bf16 %v2701_v61  ;;  %v79_v61 = vld [vmem:[#allocation2 + $0xc0] ss:$28 sps:$4 sm:$0xff]  }
  0x55   :  { %329 = vmatprep.subr.mxu1 %v143_v24  ;;  %2347 = vmatprep.subr.mxu0 %v2587_v0 }
  0x56   :  { %330 = vmatpush1.msra.mxu1 %v142_v25  ;;  %2348 = vmatpush3.msra.mxu0 %v144_v62  ;;  %v138_v62 = vunpack.c.h.bf16 %v2705_v63  ;;  %v174_v63 = vunpack.c.l.bf16 %v87_v53  ;;  %v1314_v53 = vld [vmem:[#allocation4 + $0x10] sm:$0xff] }
  0x57   :  { %331 = vmatprep.subr.mxu1 %v136_v27  ;;  %2349 = vmatprep.subr.mxu0 %v2587_v0 }
  0x58   :  { %332 = vmatpush1.msra.mxu1 %v135_v28  ;;  %2350 = vmatpush3.msra.mxu0 %v137_v1  ;;  %v131_v1 = vunpack.c.h.bf16 %v2709_v2  ;;  %v167_v2 = vunpack.c.h.bf16 %v79_v61 }
  0x59   :  { %333 = vmatprep.subr.mxu1 %v129_v30  ;;  %2351 = vmatprep.subr.mxu0 %v2587_v0 }
  0x5a   :  { %334 = vmatpush1.msra.mxu1 %v128_v31  ;;  %2352 = vmatpush3.msra.mxu0 %v130_v4  ;;  %v124_v4 = vunpack.c.h.bf16 %v2713_v5  ;;  %v71_v5 = vld [vmem:[#allocation2 + $0x88] ss:$28 sps:$4 sm:$0xff]  }
  0x5b   :  { %335 = vmatprep.subr.mxu1 %v122_v33  ;;  %2353 = vmatprep.subr.mxu0 %v2587_v0 }
  0x5c   :  { %336 = vmatpush1.msra.mxu1 %v121_v34  ;;  %2354 = vmatpush3.msra.mxu0 %v123_v7  ;;  %v117_v7 = vunpack.c.h.bf16 %v2715_v6  ;;  %v160_v6 = vunpack.c.l.bf16 %v79_v61  ;;  %v1313_v61 = vld [vmem:[#allocation4 + $0x8] sm:$0xff] }
  0x5d   :  { %337 = vmatprep.subr.mxu1 %v115_v35  ;;  %2355 = vmatprep.subr.mxu0 %v2587_v0  ;;  %v222_v35 = vunpack.c.h.bf16 %v2658_v37  ;;  %v111_v37 = vld [vmem:[#allocation2 + $0x1a0] ss:$28 sps:$4 sm:$0xff]  }
  0x5e   :  { %338 = vmatpush1.msra.mxu1 %v114_v36  ;;  %2356 = vmatpush3.msra.mxu0 %v116_v8  ;;  %v223_v38 = vunpack.c.h.bf16 %v111_v37  ;;  %v216_v39 = vunpack.c.l.bf16 %v111_v37 }
  0x5f   :  { %372 = vmatmul.mubr.f32.vlgmr.msra.gmra.mxu1 %v2630_v52  ;;  %2366 = vmatprep.subr.mxu1 %v2587_v0 }
  0x60   :  { %375 = vmatprep.mubr.f32.mxu1 %v2587_v0  ;;  %2421 = vmatprep.subr.mxu0 %v2587_v0 }
  0x61   :  { %2358 = vmatmul.mubr.f32.vlgmr.msra.gmra.mxu0 %v2630_v52 }
  0x62   :  { %2360 = vmatprep.mubr.msk.f32.mxu0 %vm2588_vm0, %v2587_v0 }
  0x63   :  { %376 = vmatmul.mubr.f32.gmra.mxu1 %v2637_v59 }
  0x64   :  { %381 = vmatprep.mubr.f32.mxu1 %v2587_v0 }
  0x65   :  { %2361 = vmatmul.mubr.f32.gmra.mxu0 %v2637_v59 }
  0x66   :  { %2363 = vmatprep.mubr.msk.f32.mxu0 %vm2588_vm0, %v2587_v0 }
  0x67   :  { %382 = vmatmul.mubr.f32.gmra.mxu1 %v2644_v3 }
  0x68   :  { %2368 = vmatprep.mubr.msk.f32.mxu1 %vm2588_vm0, %v2587_v0 }
  0x69   :  { %2364 = vmatmul.mubr.f32.gmra.mxu0 %v2644_v3 }
  0x6a   :  { %2423 = vmatprep.mubr.msk.f32.mxu0 %vm2588_vm0, %v2587_v0 }
  0xff   :  { %v2731_v9 = vpop.f32.mrf.mxu1 }
 0x100   :  { %v538_v59 = vrot.slane %v2731_v9, 4 }
 0x101   :  { %v295_v10 = vpop.f32.mrf.mxu1 }
 0x103   :  { %v298_v11 = vpop.f32.mrf.mxu1 }
 0x105   :  { %v299_v12 = vpop.f32.mrf.mxu1 }
 0x106   :  { %2367 = vmatpush3.xpose.msra.mxu1 %v299_v12 }
 0x107   :  { %v303_v52 = vpop.f32.mrf.mxu1  ;;  %2371 = vmatprep.subr.mxu1 %v2587_v0 }
 0x109   :  { %v304_v13 = vpop.f32.mrf.mxu1  ;;  %2369 = vmatmul.mubr.f32.vlgmr.msra.gmra.mxu1 %v2731_v9 }
 0x10a   :  { %2372 = vmatpush3.xpose.msra.mxu1 %v304_v13  ;;  %2373 = vmatprep.mubr.msk.f32.mxu1 %vm2588_vm0, %v2587_v0 }
 0x10b   :  { %2376 = vmatprep.subr.mxu1 %v2587_v0 }
 0x10d   :  { %2374 = vmatmul.mubr.f32.vlgmr.msra.gmra.mxu1 %v538_v59 }
 0x10e   :  { %2378 = vmatprep.mubr.msk.f32.mxu1 %vm2588_vm0, %v2587_v0 }
 0x11f   :  { %v373_v3 = vpop.f32.mrf.mxu1 }
 0x121   :  { %v374_v14 = vpop.f32.mrf.mxu1  ;;  %v454_v17 = vpop.f32.mrf.mxu0 }
 0x123   :  { %v377_v15 = vpop.f32.mrf.mxu1  ;;  %v2359_v18 = vpop.f32.mrf.mxu0 }
 0x124   :  { %2377 = vmatpush3.msra.mxu1 %v377_v15 }
 0x125   :  { %v379_v16 = vpop.f32.mrf.mxu1  ;;  %2381 = vmatprep.subr.mxu1 %v2587_v0  ;;  %v458_v8 = vpop.f32.mrf.mxu0 }
 0x126   :  { %2422 = vmatpush3.xpose.msra.mxu0 %v379_v16 }
 0x127   :  { %2426 = vmatprep.subr.mxu0 %v2587_v0  ;;  %v383_v19 = vpop.f32.mrf.mxu1  ;;  %v2362_v10 = vpop.f32.mrf.mxu0 }
 0x129   :  { %v2743_v20 = vpop.f32.mrf.mxu1  ;;  %v463_v11 = vpop.f32.mrf.mxu0 }
 0x12b   :  { %v2365_v12 = vpop.f32.mrf.mxu0 }
 0x12c   :  { %v1322_v12 = vld [vmem:[#allocation4 + $0x50] sm:$0xff] }
 0x1c9   :  { %v533_v21 = vpop.f32.mrf.mxu1 }
 0x1cb   :  { %v2370_v22 = vpop.f32.mrf.mxu1 }
 0x1cd   :  { %v606_v23 = vpop.f32.mrf.mxu1 }
 0x1ce   :  { %v610_v24 = vmax.f32 %v533_v21, %v606_v23 }
 0x1cf   :  { %v2375_v25 = vpop.f32.mrf.mxu1 }
 0x1d0   :  { %v611_v26 = vsub.f32 %v533_v21, %v610_v24  ;;  %v614_v27 = vsub.f32 %v606_v23, %v610_v24 }
 0x1d2   :  { %v612_v28 = vmul.f32 1.442695, %v611_v26  ;;  %v615_v29 = vmul.f32 1.442695, %v614_v27 }
 0x1d4   :  { %2519 = vpow2.f32 %v612_v28 }
 0x1d5   :  { %2521 = vpow2.f32 %v615_v29 }
 0x1e1   :  { %v2520_v30 = vpop.eup %2519 }
 0x1e2   :  { %v2522_v31 = vpop.eup %2521 }
 0x1e3   :  { %v617_v32 = vadd.f32 %v2522_v31, %v2520_v30 }
 0x1e5   :  { %2523 = vrcp.f32 %v617_v32 }
 0x1f2   :  { %v2524_v33 = vpop.eup %2523 }
 0x1f3   :  { %v619_v34 = vmul.f32 %v2524_v33, %v2520_v30  ;;  %v620_v36 = vmul.f32 %v2524_v33, %v2522_v31 }
 0x1f5   :  { %2379 = vmatmul.mubr.msk.f32.vlgmr.msra.gmra.mxu1 %vm621_vm1, %v619_v34  ;;  %v153_v34 = vunpack.c.h.bf16 %v71_v5 }
 0x1f6   :  { %2382 = vmatpush3.msra.mxu1 %v383_v19  ;;  %2383 = vmatprep.mubr.msk.f32.mxu1 %vm2588_vm0, %v2587_v0 }
 0x1f7   :  { %2386 = vmatprep.subr.mxu1 %v2587_v0 }
 0x1f9   :  { %2384 = vmatmul.mubr.msk.f32.vlgmr.msra.gmra.mxu1 %vm621_vm1, %v620_v36  ;;  %v146_v36 = vunpack.c.l.bf16 %v71_v5  ;;  %v1312_v5 = vld [vmem:[#allocation4] sm:$0xff] }
 0x1fa   :  { %2387 = vmatpush3.msra.mxu1 %v222_v35  ;;  %2418 = vmatprep.mubr.msk.f32.mxu1 %vm2588_vm0, %v2587_v0 }
 0x1fb   :  { %2388 = vmatprep.subr.mxu1 %v2587_v0 }
 0x1fc   :  { %2389 = vmatpush3.msra.mxu1 %v215_v40 }
 0x1fd   :  { %2390 = vmatprep.subr.mxu1 %v2587_v0 }
 0x1fe   :  { %2391 = vmatpush3.msra.mxu1 %v208_v41 }
 0x1ff   :  { %2392 = vmatprep.subr.mxu1 %v2587_v0 }
 0x200   :  { %2393 = vmatpush3.msra.mxu1 %v201_v43 }
 0x201   :  { %2394 = vmatprep.subr.mxu1 %v2587_v0 }
 0x202   :  { %2395 = vmatpush3.msra.mxu1 %v194_v45 }
 0x203   :  { %2396 = vmatprep.subr.mxu1 %v2587_v0 }
 0x204   :  { %2397 = vmatpush3.msra.mxu1 %v187_v47 }
 0x205   :  { %2398 = vmatprep.subr.mxu1 %v2587_v0 }
 0x206   :  { %2399 = vmatpush3.msra.mxu1 %v180_v49 }
 0x207   :  { %2400 = vmatprep.subr.mxu1 %v2587_v0 }
 0x208   :  { %2401 = vmatpush3.msra.mxu1 %v173_v51 }
 0x209   :  { %2402 = vmatprep.subr.mxu1 %v2587_v0 }
 0x20a   :  { %2403 = vmatpush3.msra.mxu1 %v166_v54 }
 0x20b   :  { %2404 = vmatprep.subr.mxu1 %v2587_v0 }
 0x20c   :  { %2405 = vmatpush3.msra.mxu1 %v159_v55 }
 0x20d   :  { %2406 = vmatprep.subr.mxu1 %v2587_v0 }
 0x20e   :  { %2407 = vmatpush3.msra.mxu1 %v152_v57 }
 0x20f   :  { %2408 = vmatprep.subr.mxu1 %v2587_v0 }
 0x210   :  { %2409 = vmatpush3.msra.mxu1 %v145_v60 }
 0x211   :  { %2410 = vmatprep.subr.mxu1 %v2587_v0 }
 0x212   :  { %2411 = vmatpush3.msra.mxu1 %v138_v62 }
 0x213   :  { %2412 = vmatprep.subr.mxu1 %v2587_v0 }
 0x214   :  { %2413 = vmatpush3.msra.mxu1 %v131_v1 }
 0x215   :  { %2414 = vmatprep.subr.mxu1 %v2587_v0 }
 0x216   :  { %2415 = vmatpush3.msra.mxu1 %v124_v4 }
 0x217   :  { %2416 = vmatprep.subr.mxu1 %v2587_v0 }
 0x218   :  { %2417 = vmatpush3.msra.mxu1 %v117_v7 }
 0x219   :  { %2419 = vmatmul.mubr.f32.vlgmr.msra.gmra.mxu1 %v2731_v9  ;;  %2476 = vmatprep.subr.mxu1 %v2587_v0 }
 0x21a   :  { %2508 = vmatprep.mubr.msk.f32.mxu1 %vm2588_vm0, %v2587_v0  ;;  %2477 = vmatpush3.msra.mxu1 %v223_v38 }
 0x21b   :  { %2478 = vmatprep.subr.mxu1 %v2587_v0 }
 0x21c   :  { %2479 = vmatpush3.msra.mxu1 %v216_v39  ;;  %v1316_v39 = vld [vmem:[#allocation4 + $0x20] sm:$0xff] }
 0x21d   :  { %2480 = vmatprep.subr.mxu1 %v2587_v0  ;;  %v1353_v42 = vunpack.c.h.bf16 %v1316_v39 }
 0x21e   :  { %2481 = vmatpush3.msra.mxu1 %v209_v44  ;;  %v1352_v44 = vunpack.c.l.bf16 %v1316_v39  ;;  %v1509_v39 = vld [vmem:[#allocation4 + $0x178] sm:$0xff] }
 0x21f   :  { %2482 = vmatprep.subr.mxu1 %v2587_v0 }
 0x220   :  { %2483 = vmatpush3.msra.mxu1 %v202_v48  ;;  %v1351_v48 = vunpack.c.h.bf16 %v1315_v46 }
 0x221   :  { %2484 = vmatprep.subr.mxu1 %v2587_v0 }
 0x222   :  { %2485 = vmatpush3.msra.mxu1 %v195_v50  ;;  %v1350_v50 = vunpack.c.l.bf16 %v1315_v46  ;;  %v1556_v46 = vunpack.c.l.bf16 %v1509_v39 }
 0x223   :  { %2486 = vmatprep.subr.mxu1 %v2587_v0 }
 0x224   :  { %2487 = vmatpush3.msra.mxu1 %v188_v56  ;;  %v1349_v56 = vunpack.c.h.bf16 %v1314_v53 }
 0x225   :  { %2488 = vmatprep.subr.mxu1 %v2587_v0 }
 0x226   :  { %2489 = vmatpush3.msra.mxu1 %v181_v58  ;;  %v1348_v58 = vunpack.c.l.bf16 %v1314_v53 }
 0x227   :  { %2490 = vmatprep.subr.mxu1 %v2587_v0 }
 0x228   :  { %2491 = vmatpush3.msra.mxu1 %v174_v63  ;;  %v1347_v63 = vunpack.c.h.bf16 %v1313_v61 }
 0x229   :  { %2492 = vmatprep.subr.mxu1 %v2587_v0 }
 0x22a   :  { %2493 = vmatpush3.msra.mxu1 %v167_v2  ;;  %v1346_v2 = vunpack.c.l.bf16 %v1313_v61 }
 0x22b   :  { %2494 = vmatprep.subr.mxu1 %v2587_v0 }
 0x22c   :  { %2495 = vmatpush3.msra.mxu1 %v160_v6  ;;  %v1345_v6 = vunpack.c.h.bf16 %v1312_v5 }
 0x22d   :  { %2496 = vmatprep.subr.mxu1 %v2587_v0 }
 0x22e   :  { %2497 = vmatpush3.msra.mxu1 %v153_v34  ;;  %v1344_v34 = vunpack.c.l.bf16 %v1312_v5 }
 0x22f   :  { %2498 = vmatprep.subr.mxu1 %v2587_v0 }
 0x230   :  { %2499 = vmatpush3.msra.mxu1 %v146_v36 }
 0x231   :  { %2500 = vmatprep.subr.mxu1 %v2587_v0 }
 0x2b5   :  { %v691_v52 = vpop.f32.mrf.mxu1 }
 0x2b7   :  { %v2380_v13 = vpop.f32.mrf.mxu1 }
 0x2b8   :  { %v1321_v13 = vld [vmem:[#allocation4 + $0x48] sm:$0xff] }
 0x2b9   :  { %v764_v59 = vpop.f32.mrf.mxu1 }
 0x2ba   :  { %v769_v14 = vrot.slane %v764_v59, 4  ;;  %v1365_v59 = vunpack.c.h.bf16 %v1322_v12 }
 0x2bb   :  { %v2385_v3 = vpop.f32.mrf.mxu1 }
 0x2bc   :  { %v772_v15 = vsel %vm771_vm2, %v691_v52, %v769_v14  ;;  %v1364_v3 = vunpack.c.l.bf16 %v1322_v12  ;;  %v1320_v14 = vld [vmem:[#allocation4 + $0x40] sm:$0xff] }
 0x2d9   :  { %v839_v16 = vpop.f32.mrf.mxu1 }
 0x2da   :  { %v2820_v17 = vadd.f32 %v839_v16, %v772_v15  ;;  %v1363_v15 = vunpack.c.h.bf16 %v1321_v13  ;;  %v1362_v16 = vunpack.c.l.bf16 %v1321_v13 }
 0x2db   :  { %v2420_v9 = vpop.f32.mrf.mxu1 }
 0x2dc   :  { %2424 = vmatmul.mubr.f32.vlgmr.msra.gmra.mxu0 %v2820_v17  ;;  %v914_v18 = vrot.slane %v2820_v17, 4  ;;  %v1360_v9 = vunpack.c.l.bf16 %v1320_v14 }
 0x2dd   :  { %2427 = vmatpush3.xpose.msra.mxu0 %v2743_v20  ;;  %2428 = vmatprep.mubr.msk.f32.mxu0 %vm2588_vm0, %v2587_v0 }
 0x2de   :  { %2431 = vmatprep.subr.mxu0 %v2587_v0 }
 0x2e0   :  { %2429 = vmatmul.mubr.f32.vlgmr.msra.gmra.mxu0 %v914_v18 }
 0x2e1   :  { %2432 = vmatpush3.msra.mxu0 %v458_v8  ;;  %2433 = vmatprep.mubr.msk.f32.mxu0 %vm2588_vm0, %v2587_v0  ;;  %v1323_v8 = vld [vmem:[#allocation4 + $0x58] sm:$0xff] }
 0x2e2   :  { %2436 = vmatprep.subr.mxu0 %v2587_v0  ;;  %v1366_v52 = vunpack.c.l.bf16 %v1323_v8 }
 0x39c   :  { %v909_v19 = vpop.f32.mrf.mxu0 }
 0x39e   :  { %v2425_v21 = vpop.f32.mrf.mxu0 }
 0x3a0   :  { %v982_v22 = vpop.f32.mrf.mxu0 }
 0x3a1   :  { %v986_v23 = vmax.f32 %v909_v19, %v982_v22 }
 0x3a2   :  { %v2430_v24 = vpop.f32.mrf.mxu0 }
 0x3a3   :  { %v987_v20 = vsub.f32 %v909_v19, %v986_v23  ;;  %v990_v25 = vsub.f32 %v982_v22, %v986_v23 }
 0x3a5   :  { %v988_v26 = vmul.f32 1.442695, %v987_v20  ;;  %v991_v27 = vmul.f32 1.442695, %v990_v25 }
 0x3a7   :  { %2525 = vpow2.f32 %v988_v26 }
 0x3a8   :  { %2527 = vpow2.f32 %v991_v27  ;;  %v1319_v27 = vld [vmem:[#allocation4 + $0x38] sm:$0xff] }
 0x3b4   :  { %v2526_v28 = vpop.eup %2525 }
 0x3b5   :  { %v2528_v29 = vpop.eup %2527 }
 0x3b6   :  { %v993_v30 = vadd.f32 %v2528_v29, %v2526_v28 }
 0x3b8   :  { %2529 = vrcp.f32 %v993_v30  ;;  %v1318_v30 = vld [vmem:[#allocation4 + $0x30] sm:$0xff] }
 0x3c5   :  { %v2530_v31 = vpop.eup %2529 }
 0x3c6   :  { %v995_v32 = vmul.f32 %v2530_v31, %v2526_v28  ;;  %v996_v33 = vmul.f32 %v2530_v31, %v2528_v29  ;;  %v1359_v28 = vunpack.c.h.bf16 %v1319_v27  ;;  %v1358_v29 = vunpack.c.l.bf16 %v1319_v27 }
 0x3c7   :  { %v1357_v31 = vunpack.c.h.bf16 %v1318_v30 }
 0x3c8   :  { %2434 = vmatmul.mubr.msk.f32.vlgmr.msra.gmra.mxu0 %vm621_vm1, %v995_v32  ;;  %v1356_v32 = vunpack.c.l.bf16 %v1318_v30 }
 0x3c9   :  { %2437 = vmatpush3.msra.mxu0 %v463_v11  ;;  %2438 = vmatprep.mubr.msk.f32.mxu0 %vm2588_vm0, %v2587_v0 }
 0x3ca   :  { %2441 = vmatprep.subr.mxu0 %v2587_v0 }
 0x3cc   :  { %2439 = vmatmul.mubr.msk.f32.vlgmr.msra.gmra.mxu0 %vm621_vm1, %v996_v33  ;;  %v1317_v33 = vld [vmem:[#allocation4 + $0x28] sm:$0xff] }
 0x3cd   :  { %2442 = vmatpush3.msra.mxu0 %v222_v35  ;;  %2473 = vmatprep.mubr.msk.f32.mxu0 %vm2588_vm0, %v2587_v0  ;;  %v63_v35 = vld [vmem:[#allocation2 + $0x50] ss:$28 sps:$4 sm:$0xff]   ;;  %v1355_v37 = vunpack.c.h.bf16 %v1317_v33  ;;  %v1354_v38 = vunpack.c.l.bf16 %v1317_v33 }
 0x3ce   :  { %2443 = vmatprep.subr.mxu0 %v2587_v0 }
 0x3cf   :  { %2444 = vmatpush3.msra.mxu0 %v215_v40  ;;  %v139_v40 = vunpack.c.h.bf16 %v63_v35 }
 0x3d0   :  { %2445 = vmatprep.subr.mxu0 %v2587_v0 }
 0x3d1   :  { %2446 = vmatpush3.msra.mxu0 %v208_v41  ;;  %v132_v41 = vunpack.c.l.bf16 %v63_v35  ;;  %2501 = vmatpush3.msra.mxu1 %v139_v40  ;;  %v1343_v35 = vld [vmem:[#allocation4 + $0xf8] sm:$0xff] }
 0x3d2   :  { %2447 = vmatprep.subr.mxu0 %v2587_v0  ;;  %2502 = vmatprep.subr.mxu1 %v2587_v0  ;;  %v1407_v36 = vunpack.c.h.bf16 %v1343_v35  ;;  %v1406_v40 = vunpack.c.l.bf16 %v1343_v35 }
 0x3d3   :  { %2448 = vmatpush3.msra.mxu0 %v201_v43  ;;  %v55_v43 = vld [vmem:[#allocation2 + $0x18] ss:$28 sps:$4 sm:$0xff]   ;;  %2503 = vmatpush3.msra.mxu1 %v132_v41 }
 0x3d4   :  { %2449 = vmatprep.subr.mxu0 %v2587_v0  ;;  %2504 = vmatprep.subr.mxu1 %v2587_v0  ;;  %v1342_v41 = vld [vmem:[#allocation4 + $0xf0] sm:$0xff] }
 0x3d5   :  { %2450 = vmatpush3.msra.mxu0 %v194_v45  ;;  %v125_v45 = vunpack.c.h.bf16 %v55_v43 }
 0x3d6   :  { %2451 = vmatprep.subr.mxu0 %v2587_v0 }
 0x3d7   :  { %2452 = vmatpush3.msra.mxu0 %v187_v47  ;;  %2505 = vmatpush3.msra.mxu1 %v125_v45  ;;  %v118_v47 = vunpack.c.l.bf16 %v55_v43  ;;  %v1405_v43 = vunpack.c.h.bf16 %v1342_v41  ;;  %v1404_v45 = vunpack.c.l.bf16 %v1342_v41 }
 0x3d8   :  { %2453 = vmatprep.subr.mxu0 %v2587_v0  ;;  %2506 = vmatprep.subr.mxu1 %v2587_v0 }
 0x3d9   :  { %2454 = vmatpush3.msra.mxu0 %v180_v49  ;;  %2507 = vmatpush3.msra.mxu1 %v118_v47  ;;  %v1327_v49 = vld [vmem:[#allocation4 + $0x78] sm:$0xff]  ;;  %v1341_v47 = vld [vmem:[#allocation4 + $0xe8] sm:$0xff] }
 0x3da   :  { %2455 = vmatprep.subr.mxu0 %v2587_v0 }
 0x3db   :  { %2456 = vmatpush3.msra.mxu0 %v173_v51  ;;  %v1326_v51 = vld [vmem:[#allocation4 + $0x70] sm:$0xff] }
 0x3dc   :  { %2457 = vmatprep.subr.mxu0 %v2587_v0 }
 0x3dd   :  { %2458 = vmatpush3.msra.mxu0 %v166_v54  ;;  %v1325_v54 = vld [vmem:[#allocation4 + $0x68] sm:$0xff] }
 0x3de   :  { %2459 = vmatprep.subr.mxu0 %v2587_v0 }
 0x3df   :  { %2460 = vmatpush3.msra.mxu0 %v159_v55  ;;  %v1374_v55 = vunpack.c.l.bf16 %v1327_v49 }
 0x3e0   :  { %2461 = vmatprep.subr.mxu0 %v2587_v0 }
 0x3e1   :  { %2462 = vmatpush3.msra.mxu0 %v152_v57  ;;  %v1375_v57 = vunpack.c.h.bf16 %v1327_v49  ;;  %v1403_v49 = vunpack.c.h.bf16 %v1341_v47 }
 0x3e2   :  { %2463 = vmatprep.subr.mxu0 %v2587_v0 }
 0x3e3   :  { %2464 = vmatpush3.msra.mxu0 %v145_v60  ;;  %v1373_v60 = vunpack.c.h.bf16 %v1326_v51 }
 0x3e4   :  { %2465 = vmatprep.subr.mxu0 %v2587_v0 }
 0x3e5   :  { %2466 = vmatpush3.msra.mxu0 %v138_v62  ;;  %v1372_v62 = vunpack.c.l.bf16 %v1326_v51  ;;  %v1402_v51 = vunpack.c.l.bf16 %v1341_v47 }
 0x3e6   :  { %2467 = vmatprep.subr.mxu0 %v2587_v0 }
 0x3e7   :  { %2468 = vmatpush3.msra.mxu0 %v131_v1  ;;  %v1324_v1 = vld [vmem:[#allocation4 + $0x60] sm:$0xff] }
 0x3e8   :  { %2469 = vmatprep.subr.mxu0 %v2587_v0  ;;  %v1369_v10 = vunpack.c.h.bf16 %v1324_v1  ;;  %v1368_v11 = vunpack.c.l.bf16 %v1324_v1 }
 0x3e9   :  { %2470 = vmatpush3.msra.mxu0 %v124_v4  ;;  %v1371_v4 = vunpack.c.h.bf16 %v1325_v54 }
 0x3ea   :  { %2471 = vmatprep.subr.mxu0 %v2587_v0  ;;  %v1367_v0 = vunpack.c.h.bf16 %v1323_v8 }
 0x3eb   :  { %2472 = vmatpush3.msra.mxu0 %v117_v7  ;;  %v1370_v7 = vunpack.c.l.bf16 %v1325_v54  ;;  %v1340_v54 = vld [vmem:[#allocation4 + $0xe0] sm:$0xff] }
 0x3ec   :  { %2474 = vmatmul.mubr.f32.vlgmr.msra.gmra.mxu0 %v2820_v17  ;;  %1420 = vmatprep.subr.mxu0 %v1375_v57  ;;  %v1361_v17 = vunpack.c.h.bf16 %v1320_v14  ;;  %v1400_v57 = vunpack.c.l.bf16 %v1340_v54  ;;  %v1333_v14 = vld [vmem:[#allocation4 + $0xa8] sm:$0xff] }
 0x3ed   :  { %1421 = vmatpush1.msra.mxu0 %v1374_v55  ;;  %v1401_v55 = vunpack.c.h.bf16 %v1340_v54 }
 0x3ee   :  { %1422 = vmatprep.subr.mxu0 %v1373_v60  ;;  %v1339_v60 = vld [vmem:[#allocation4 + $0xd8] sm:$0xff] }
 0x3ef   :  { %1423 = vmatpush1.msra.mxu0 %v1372_v62  ;;  %v1399_v62 = vunpack.c.h.bf16 %v1339_v60  ;;  %v1398_v1 = vunpack.c.l.bf16 %v1339_v60 }
 0x3f0   :  { %1424 = vmatprep.subr.mxu0 %v1371_v4  ;;  %v1338_v4 = vld [vmem:[#allocation4 + $0xd0] sm:$0xff] }
 0x3f1   :  { %1425 = vmatpush1.msra.mxu0 %v1370_v7  ;;  %v1397_v7 = vunpack.c.h.bf16 %v1338_v4  ;;  %v1396_v8 = vunpack.c.l.bf16 %v1338_v4 }
 0x3f2   :  { %1426 = vmatprep.subr.mxu0 %v1369_v10  ;;  %v1337_v10 = vld [vmem:[#allocation4 + $0xc8] sm:$0xff] }
 0x3f3   :  { %1427 = vmatpush1.msra.mxu0 %v1368_v11  ;;  %v1395_v11 = vunpack.c.h.bf16 %v1337_v10  ;;  %v1394_v12 = vunpack.c.l.bf16 %v1337_v10 }
 0x3f4   :  { %1428 = vmatprep.subr.mxu0 %v1367_v0  ;;  %v1336_v0 = vld [vmem:[#allocation4 + $0xc0] sm:$0xff] }
 0x3f5   :  { %1429 = vmatpush1.msra.mxu0 %v1366_v52  ;;  %v1393_v52 = vunpack.c.h.bf16 %v1336_v0  ;;  %v1392_v13 = vunpack.c.l.bf16 %v1336_v0 }
 0x3f6   :  { %1430 = vmatprep.subr.mxu0 %v1365_v59  ;;  %v1335_v59 = vld [vmem:[#allocation4 + $0xb8] sm:$0xff] }
 0x3f7   :  { %1431 = vmatpush1.msra.mxu0 %v1364_v3  ;;  %v1334_v3 = vld [vmem:[#allocation4 + $0xb0] sm:$0xff] }
 0x3f8   :  { %1432 = vmatprep.subr.mxu0 %v1363_v15  ;;  %v1390_v15 = vunpack.c.l.bf16 %v1335_v59 }
 0x3f9   :  { %1433 = vmatpush1.msra.mxu0 %v1362_v16  ;;  %v1391_v16 = vunpack.c.h.bf16 %v1335_v59 }
 0x3fa   :  { %1434 = vmatprep.subr.mxu0 %v1361_v17  ;;  %v1389_v17 = vunpack.c.h.bf16 %v1334_v3 }
 0x3fb   :  { %1435 = vmatpush1.msra.mxu0 %v1360_v9  ;;  %v1388_v9 = vunpack.c.l.bf16 %v1334_v3  ;;  %v1495_v3 = vld [vmem:[#allocation4 + $0x108] sm:$0xff] }
 0x3fc   :  { %1436 = vmatprep.subr.mxu0 %v1359_v28  ;;  %v1329_v28 = vld [vmem:[#allocation4 + $0x88] sm:$0xff] }
 0x3fd   :  { %1437 = vmatpush1.msra.mxu0 %v1358_v29  ;;  %v1378_v33 = vunpack.c.l.bf16 %v1329_v28 }
 0x3fe   :  { %1438 = vmatprep.subr.mxu0 %v1357_v31  ;;  %v1328_v31 = vld [vmem:[#allocation4 + $0x80] sm:$0xff] }
 0x3ff   :  { %1439 = vmatpush1.msra.mxu0 %v1356_v32  ;;  %v1379_v32 = vunpack.c.h.bf16 %v1329_v28 }
 0x400   :  { %1440 = vmatprep.subr.mxu0 %v1355_v37  ;;  %v1377_v37 = vunpack.c.h.bf16 %v1328_v31 }
 0x401   :  { %1441 = vmatpush1.msra.mxu0 %v1354_v38  ;;  %v1376_v38 = vunpack.c.l.bf16 %v1328_v31 }
 0x402   :  { %1442 = vmatprep.subr.mxu0 %v1353_v42  ;;  %v1508_v42 = vld [vmem:[#allocation4 + $0x170] sm:$0xff] }
 0x403   :  { %1443 = vmatpush1.msra.mxu0 %v1352_v44  ;;  %v1507_v44 = vld [vmem:[#allocation4 + $0x168] sm:$0xff]  ;;  %v1554_v53 = vunpack.c.l.bf16 %v1508_v42 }
 0x404   :  { %1444 = vmatprep.subr.mxu0 %v1351_v48  ;;  %v1557_v48 = vunpack.c.h.bf16 %v1509_v39  ;;  %v1552_v61 = vunpack.c.l.bf16 %v1507_v44  ;;  %v1519_v39 = vld [vmem:[#allocation4 + $0x1c8] sm:$0xff] }
 0x405   :  { %1445 = vmatpush1.msra.mxu0 %v1350_v50  ;;  %v1555_v50 = vunpack.c.h.bf16 %v1508_v42 }
 0x406   :  { %1446 = vmatprep.subr.mxu0 %v1349_v56  ;;  %v1506_v56 = vld [vmem:[#allocation4 + $0x160] sm:$0xff]  ;;  %1603 = vmatprep.subr.mxu1 %v1557_v48  ;;  %v1577_v48 = vunpack.c.h.bf16 %v1519_v39 }
 0x407   :  { %1447 = vmatpush1.msra.mxu0 %v1348_v58  ;;  %v1553_v58 = vunpack.c.h.bf16 %v1507_v44  ;;  %v1550_v5 = vunpack.c.l.bf16 %v1506_v56 }
 0x408   :  { %1448 = vmatprep.subr.mxu0 %v1347_v63  ;;  %v1505_v63 = vld [vmem:[#allocation4 + $0x158] sm:$0xff] }
 0x409   :  { %1449 = vmatpush1.msra.mxu0 %v1346_v2  ;;  %v1551_v2 = vunpack.c.h.bf16 %v1506_v56  ;;  %v1548_v35 = vunpack.c.l.bf16 %v1505_v63 }
 0x40a   :  { %1450 = vmatprep.subr.mxu0 %v1345_v6  ;;  %v1504_v6 = vld [vmem:[#allocation4 + $0x150] sm:$0xff] }
 0x40b   :  { %1451 = vmatpush1.msra.mxu0 %v1344_v34  ;;  %v1549_v34 = vunpack.c.h.bf16 %v1505_v63  ;;  %v1546_v41 = vunpack.c.l.bf16 %v1504_v6 }
 0x40c   :  { %1452 = vmatprep.subr.mxu0 %v1407_v36  ;;  %v1503_v36 = vld [vmem:[#allocation4 + $0x148] sm:$0xff] }
 0x40d   :  { %1453 = vmatpush2.msra.mxu0 %v1406_v40  ;;  %v1547_v40 = vunpack.c.h.bf16 %v1504_v6  ;;  %v1544_v47 = vunpack.c.l.bf16 %v1503_v36 }
 0x40e   :  { %1454 = vmatprep.subr.mxu0 %v1405_v43  ;;  %v1502_v43 = vld [vmem:[#allocation4 + $0x140] sm:$0xff] }
 0x40f   :  { %1455 = vmatpush2.msra.mxu0 %v1404_v45  ;;  %v1545_v45 = vunpack.c.h.bf16 %v1503_v36  ;;  %v1542_v54 = vunpack.c.l.bf16 %v1502_v43 }
 0x410   :  { %1456 = vmatprep.subr.mxu0 %v1403_v49  ;;  %v1501_v49 = vld [vmem:[#allocation4 + $0x138] sm:$0xff] }
 0x411   :  { %1457 = vmatpush2.msra.mxu0 %v1402_v51  ;;  %v1543_v51 = vunpack.c.h.bf16 %v1502_v43  ;;  %v1540_v60 = vunpack.c.l.bf16 %v1501_v49 }
 0x412   :  { %1458 = vmatprep.subr.mxu0 %v1401_v55  ;;  %v1500_v55 = vld [vmem:[#allocation4 + $0x130] sm:$0xff] }
 0x413   :  { %1459 = vmatpush2.msra.mxu0 %v1400_v57  ;;  %v1541_v57 = vunpack.c.h.bf16 %v1501_v49  ;;  %v1538_v4 = vunpack.c.l.bf16 %v1500_v55 }
 0x414   :  { %1460 = vmatprep.subr.mxu0 %v1399_v62  ;;  %v1499_v62 = vld [vmem:[#allocation4 + $0x128] sm:$0xff] }
 0x415   :  { %1461 = vmatpush2.msra.mxu0 %v1398_v1  ;;  %v1539_v1 = vunpack.c.h.bf16 %v1500_v55  ;;  %v1536_v10 = vunpack.c.l.bf16 %v1499_v62 }
 0x416   :  { %1462 = vmatprep.subr.mxu0 %v1397_v7  ;;  %v1498_v7 = vld [vmem:[#allocation4 + $0x120] sm:$0xff] }
 0x417   :  { %1463 = vmatpush2.msra.mxu0 %v1396_v8  ;;  %v1537_v8 = vunpack.c.h.bf16 %v1499_v62  ;;  %v1534_v0 = vunpack.c.l.bf16 %v1498_v7 }
 0x418   :  { %1464 = vmatprep.subr.mxu0 %v1395_v11  ;;  %v1497_v11 = vld [vmem:[#allocation4 + $0x118] sm:$0xff] }
 0x419   :  { %1465 = vmatpush2.msra.mxu0 %v1394_v12  ;;  %v1535_v12 = vunpack.c.h.bf16 %v1498_v7  ;;  %v1532_v59 = vunpack.c.l.bf16 %v1497_v11 }
 0x41a   :  { %1466 = vmatprep.subr.mxu0 %v1393_v52  ;;  %v1496_v52 = vld [vmem:[#allocation4 + $0x110] sm:$0xff] }
 0x41b   :  { %1467 = vmatpush2.msra.mxu0 %v1392_v13  ;;  %v1533_v13 = vunpack.c.h.bf16 %v1497_v11 }
 0x41c   :  { %1468 = vmatprep.subr.mxu0 %v1391_v16  ;;  %v1494_v16 = vld [vmem:[#allocation4 + $0x100] sm:$0xff] }
 0x41d   :  { %1469 = vmatpush2.msra.mxu0 %v1390_v15  ;;  %v1530_v15 = vunpack.c.l.bf16 %v1496_v52 }
 0x41e   :  { %1470 = vmatprep.subr.mxu0 %v1389_v17  ;;  %v1529_v17 = vunpack.c.h.bf16 %v1495_v3 }
 0x41f   :  { %1471 = vmatpush2.msra.mxu0 %v1388_v9  ;;  %v1528_v9 = vunpack.c.l.bf16 %v1495_v3 }
 0x488   :  { %v1066_v18 = vpop.f32.mrf.mxu0 }
 0x48a   :  { %v2435_v19 = vpop.f32.mrf.mxu0 }
 0x48b   :  { %v1311_v19 = vld [vmem:[%s2942_s1] sm:$0xff] }
 0x48c   :  { %v1139_v21 = vpop.f32.mrf.mxu0  ;;  %1484 = vmatprep.mubr.f32.mxu0 %v1311_v19  ;;  %v1527_v19 = vunpack.c.h.bf16 %v1494_v16 }
 0x48d   :  { %v1144_v23 = vrot.slane %v1139_v21, 4  ;;  %v1387_v21 = vunpack.c.h.bf16 %v1333_v14 }
 0x48e   :  { %v2440_v22 = vpop.f32.mrf.mxu0 }
 0x48f   :  { %v1146_v24 = vsel %vm771_vm2, %v1066_v18, %v1144_v23  ;;  %v1332_v18 = vld [vmem:[#allocation4 + $0xa0] sm:$0xff]  ;;  %v1386_v22 = vunpack.c.l.bf16 %v1333_v14  ;;  %v1331_v23 = vld [vmem:[#allocation4 + $0x98] sm:$0xff]  ;;  %1472 = vmatprep.subr.mxu0 %v1387_v21  ;;  %v1531_v14 = vunpack.c.h.bf16 %v1496_v52  ;;  %v1526_v21 = vunpack.c.l.bf16 %v1494_v16 }
 0x490   :  { %v1382_v27 = vunpack.c.l.bf16 %v1331_v23 }
 0x491   :  { %1473 = vmatpush2.msra.mxu0 %v1386_v22  ;;  %v1524_v22 = vld [vmem:[#allocation4 + $0x1f0] sm:$0xff] }
 0x4ac   :  { %v1213_v20 = vpop.f32.mrf.mxu0 }
 0x4ad   :  { %v1214_v25 = vadd.f32 %v1213_v20, %v1146_v24  ;;  %v1385_v24 = vunpack.c.h.bf16 %v1332_v18  ;;  %v1384_v20 = vunpack.c.l.bf16 %v1332_v18  ;;  %v1525_v18 = vld [vmem:[#allocation4 + $0x1f8] sm:$0xff] }
 0x4ae   :  { %v2475_v26 = vpop.f32.mrf.mxu0 }
 0x4af   :  { %2509 = vmatmul.mubr.f32.vlgmr.msra.gmra.mxu1 %v1214_v25  ;;  %v1330_v25 = vld [vmem:[#allocation4 + $0x90] sm:$0xff]  ;;  %v1383_v26 = vunpack.c.h.bf16 %v1331_v23  ;;  %1474 = vmatprep.subr.mxu0 %v1385_v24  ;;  %v1589_v23 = vunpack.c.h.bf16 %v1525_v18  ;;  %v1588_v24 = vunpack.c.l.bf16 %v1525_v18 }
 0x4b0   :  { %v1381_v29 = vunpack.c.h.bf16 %v1330_v25  ;;  %1475 = vmatpush2.msra.mxu0 %v1384_v20  ;;  %v1380_v30 = vunpack.c.l.bf16 %v1330_v25  ;;  %1604 = vmatpush1.msra.mxu1 %v1556_v46  ;;  %v1523_v20 = vld [vmem:[#allocation4 + $0x1e8] sm:$0xff]  ;;  %v1587_v25 = vunpack.c.h.bf16 %v1524_v22  ;;  %v1518_v46 = vld [vmem:[#allocation4 + $0x1c0] sm:$0xff] }
 0x4b1   :  { %1476 = vmatprep.subr.mxu0 %v1383_v26  ;;  %1605 = vmatprep.subr.mxu1 %v1555_v50  ;;  %v1586_v26 = vunpack.c.l.bf16 %v1524_v22  ;;  %v1585_v28 = vunpack.c.h.bf16 %v1523_v20  ;;  %v1576_v50 = vunpack.c.l.bf16 %v1519_v39  ;;  %v1575_v56 = vunpack.c.h.bf16 %v1518_v46 }
 0x4b2   :  { %1477 = vmatpush2.msra.mxu0 %v1382_v27  ;;  %1606 = vmatpush1.msra.mxu1 %v1554_v53  ;;  %v1522_v27 = vld [vmem:[#allocation4 + $0x1e0] sm:$0xff]  ;;  %v1517_v53 = vld [vmem:[#allocation4 + $0x1b8] sm:$0xff] }
 0x4b3   :  { %1478 = vmatprep.subr.mxu0 %v1381_v29  ;;  %1607 = vmatprep.subr.mxu1 %v1553_v58  ;;  %v1584_v29 = vunpack.c.l.bf16 %v1523_v20  ;;  %v1583_v31 = vunpack.c.h.bf16 %v1522_v27  ;;  %v1574_v58 = vunpack.c.l.bf16 %v1518_v46  ;;  %v1573_v63 = vunpack.c.h.bf16 %v1517_v53  ;;  %v1690_v20 = vld [vmem:[#allocation4 + $0x268] sm:$0xff] }
 0x4b4   :  { %1479 = vmatpush2.msra.mxu0 %v1380_v30  ;;  %1608 = vmatpush1.msra.mxu1 %v1552_v61  ;;  %v1521_v30 = vld [vmem:[#allocation4 + $0x1d8] sm:$0xff]  ;;  %v1516_v61 = vld [vmem:[#allocation4 + $0x1b0] sm:$0xff] }
 0x4b5   :  { %1480 = vmatprep.subr.mxu0 %v1379_v32  ;;  %1609 = vmatprep.subr.mxu1 %v1551_v2  ;;  %v1582_v32 = vunpack.c.l.bf16 %v1522_v27  ;;  %v1572_v2 = vunpack.c.l.bf16 %v1517_v53  ;;  %v1571_v6 = vunpack.c.h.bf16 %v1516_v61 }
 0x4b6   :  { %1481 = vmatpush2.msra.mxu0 %v1378_v33  ;;  %1610 = vmatpush1.msra.mxu1 %v1550_v5  ;;  %v1520_v33 = vld [vmem:[#allocation4 + $0x1d0] sm:$0xff]  ;;  %v1515_v5 = vld [vmem:[#allocation4 + $0x1a8] sm:$0xff] }
 0x4b7   :  { %1482 = vmatprep.subr.mxu0 %v1377_v37  ;;  %1611 = vmatprep.subr.mxu1 %v1549_v34  ;;  %v1581_v37 = vunpack.c.h.bf16 %v1521_v30  ;;  %v1579_v42 = vunpack.c.h.bf16 %v1520_v33  ;;  %v1578_v44 = vunpack.c.l.bf16 %v1520_v33  ;;  %v1570_v34 = vunpack.c.l.bf16 %v1516_v61 }
 0x4b8   :  { %1483 = vmatpush2.msra.mxu0 %v1376_v38  ;;  %1612 = vmatpush1.msra.mxu1 %v1548_v35  ;;  %v1580_v38 = vunpack.c.l.bf16 %v1521_v30  ;;  %v1514_v35 = vld [vmem:[#allocation4 + $0x1a0] sm:$0xff]  ;;  %v1569_v36 = vunpack.c.h.bf16 %v1515_v5  ;;  %v1736_v30 = vunpack.c.h.bf16 %v1690_v20 }
 0x4b9   :  { %1613 = vmatprep.subr.mxu1 %v1547_v40  ;;  %v1568_v40 = vunpack.c.l.bf16 %v1515_v5  ;;  %v1566_v43 = vunpack.c.l.bf16 %v1514_v35 }
 0x4ba   :  { %1614 = vmatpush1.msra.mxu1 %v1546_v41  ;;  %v1567_v41 = vunpack.c.h.bf16 %v1514_v35 }
 0x4bb   :  { %1615 = vmatprep.subr.mxu1 %v1545_v45 }
 0x4bc   :  { %1616 = vmatpush1.msra.mxu1 %v1544_v47 }
 0x4bd   :  { %1617 = vmatprep.subr.mxu1 %v1543_v51 }
 0x4be   :  { %1618 = vmatpush1.msra.mxu1 %v1542_v54 }
 0x4bf   :  { %1619 = vmatprep.subr.mxu1 %v1541_v57 }
 0x4c0   :  { %1620 = vmatpush1.msra.mxu1 %v1540_v60 }
 0x4c1   :  { %1621 = vmatprep.subr.mxu1 %v1539_v1 }
 0x4c2   :  { %1622 = vmatpush1.msra.mxu1 %v1538_v4 }
 0x4c3   :  { %1623 = vmatprep.subr.mxu1 %v1537_v8 }
 0x4c4   :  { %1624 = vmatpush1.msra.mxu1 %v1536_v10 }
 0x4c5   :  { %1625 = vmatprep.subr.mxu1 %v1535_v12 }
 0x4c6   :  { %1626 = vmatpush1.msra.mxu1 %v1534_v0 }
 0x4c7   :  { %1627 = vmatprep.subr.mxu1 %v1533_v13  ;;  %v1513_v13 = vld [vmem:[#allocation4 + $0x198] sm:$0xff] }
 0x4c8   :  { %1628 = vmatpush1.msra.mxu1 %v1532_v59  ;;  %v1565_v59 = vunpack.c.h.bf16 %v1513_v13  ;;  %v1564_v3 = vunpack.c.l.bf16 %v1513_v13  ;;  %v1706_v13 = vld [vmem:[#allocation4 + $0x2e8] sm:$0xff] }
 0x4c9   :  { %1629 = vmatprep.subr.mxu1 %v1531_v14  ;;  %v1512_v14 = vld [vmem:[#allocation4 + $0x190] sm:$0xff] }
 0x4ca   :  { %1630 = vmatpush1.msra.mxu1 %v1530_v15  ;;  %v1563_v15 = vunpack.c.h.bf16 %v1512_v14  ;;  %v1562_v16 = vunpack.c.l.bf16 %v1512_v14  ;;  %v1705_v14 = vld [vmem:[#allocation4 + $0x2e0] sm:$0xff] }
 0x4cb   :  { %1631 = vmatprep.subr.mxu1 %v1529_v17  ;;  %v1511_v17 = vld [vmem:[#allocation4 + $0x188] sm:$0xff] }
 0x4cc   :  { %1632 = vmatpush1.msra.mxu1 %v1528_v9  ;;  %v1561_v9 = vunpack.c.h.bf16 %v1511_v17  ;;  %v1560_v18 = vunpack.c.l.bf16 %v1511_v17  ;;  %v1704_v17 = vld [vmem:[#allocation4 + $0x2d8] sm:$0xff] }
 0x4cd   :  { %1633 = vmatprep.subr.mxu1 %v1527_v19  ;;  %v1510_v19 = vld [vmem:[#allocation4 + $0x180] sm:$0xff] }
 0x4ce   :  { %1634 = vmatpush1.msra.mxu1 %v1526_v21  ;;  %v1559_v21 = vunpack.c.h.bf16 %v1510_v19  ;;  %v1558_v22 = vunpack.c.l.bf16 %v1510_v19  ;;  %v1703_v19 = vld [vmem:[#allocation4 + $0x2d0] sm:$0xff] }
 0x4cf   :  { %1635 = vmatprep.subr.mxu1 %v1589_v23  ;;  %v1692_v23 = vld [vmem:[#allocation4 + $0x278] sm:$0xff] }
 0x4d0   :  { %1636 = vmatpush2.msra.mxu1 %v1588_v24  ;;  %v1691_v24 = vld [vmem:[#allocation4 + $0x270] sm:$0xff] }
 0x4d1   :  { %1637 = vmatprep.subr.mxu1 %v1587_v25  ;;  %v1739_v25 = vunpack.c.l.bf16 %v1692_v23  ;;  %v1738_v27 = vunpack.c.h.bf16 %v1691_v24 }
 0x4d2   :  { %1638 = vmatpush2.msra.mxu1 %v1586_v26  ;;  %v1740_v26 = vunpack.c.h.bf16 %v1692_v23  ;;  %v1702_v23 = vld [vmem:[#allocation4 + $0x2c8] sm:$0xff] }
 0x4d3   :  { %1639 = vmatprep.subr.mxu1 %v1585_v28  ;;  %v1737_v28 = vunpack.c.l.bf16 %v1691_v24  ;;  %v1762_v24 = vunpack.c.h.bf16 %v1703_v19 }
 0x4d4   :  { %1640 = vmatpush2.msra.mxu1 %v1584_v29  ;;  %v1689_v29 = vld [vmem:[#allocation4 + $0x260] sm:$0xff]  ;;  %1786 = vmatprep.subr.mxu0 %v1740_v26  ;;  %v1760_v26 = vunpack.c.h.bf16 %v1702_v23 }
 0x4d5   :  { %1641 = vmatprep.subr.mxu1 %v1583_v31  ;;  %v1735_v31 = vunpack.c.l.bf16 %v1690_v20  ;;  %v1734_v33 = vunpack.c.h.bf16 %v1689_v29  ;;  %v1761_v20 = vunpack.c.l.bf16 %v1703_v19  ;;  %v1869_v19 = vld [vmem:[#allocation4 + $0x348] sm:$0xff] }
 0x4d6   :  { %1642 = vmatpush2.msra.mxu1 %v1582_v32  ;;  %v1688_v32 = vld [vmem:[#allocation4 + $0x258] sm:$0xff] }
 0x4d7   :  { %1643 = vmatprep.subr.mxu1 %v1581_v37  ;;  %v1733_v37 = vunpack.c.l.bf16 %v1689_v29  ;;  %v1732_v39 = vunpack.c.h.bf16 %v1688_v32 }
 0x4d8   :  { %1644 = vmatpush2.msra.mxu1 %v1580_v38  ;;  %v1687_v38 = vld [vmem:[#allocation4 + $0x250] sm:$0xff] }
 0x4d9   :  { %1645 = vmatprep.subr.mxu1 %v1579_v42  ;;  %v1731_v42 = vunpack.c.l.bf16 %v1688_v32  ;;  %v1730_v46 = vunpack.c.h.bf16 %v1687_v38 }
 0x4da   :  { %1646 = vmatpush2.msra.mxu1 %v1578_v44  ;;  %v1686_v44 = vld [vmem:[#allocation4 + $0x248] sm:$0xff] }
 0x4db   :  { %1647 = vmatprep.subr.mxu1 %v1577_v48  ;;  %v1729_v48 = vunpack.c.l.bf16 %v1687_v38  ;;  %v1728_v53 = vunpack.c.h.bf16 %v1686_v44 }
 0x4dc   :  { %1648 = vmatpush2.msra.mxu1 %v1576_v50  ;;  %v1685_v50 = vld [vmem:[#allocation4 + $0x240] sm:$0xff] }
 0x4dd   :  { %1649 = vmatprep.subr.mxu1 %v1575_v56  ;;  %v1727_v56 = vunpack.c.l.bf16 %v1686_v44  ;;  %v1726_v61 = vunpack.c.h.bf16 %v1685_v50 }
 0x4de   :  { %1650 = vmatpush2.msra.mxu1 %v1574_v58  ;;  %v1684_v58 = vld [vmem:[#allocation4 + $0x238] sm:$0xff] }
 0x4df   :  { %1651 = vmatprep.subr.mxu1 %v1573_v63  ;;  %v1725_v63 = vunpack.c.l.bf16 %v1685_v50  ;;  %v1724_v5 = vunpack.c.h.bf16 %v1684_v58 }
 0x4e0   :  { %1652 = vmatpush2.msra.mxu1 %v1572_v2  ;;  %v1683_v2 = vld [vmem:[#allocation4 + $0x230] sm:$0xff] }
 0x4e1   :  { %1653 = vmatprep.subr.mxu1 %v1571_v6  ;;  %v1723_v6 = vunpack.c.l.bf16 %v1684_v58  ;;  %v1722_v35 = vunpack.c.h.bf16 %v1683_v2 }
 0x4e2   :  { %1654 = vmatpush2.msra.mxu1 %v1570_v34  ;;  %v1682_v34 = vld [vmem:[#allocation4 + $0x228] sm:$0xff] }
 0x4e3   :  { %1655 = vmatprep.subr.mxu1 %v1569_v36  ;;  %v1721_v36 = vunpack.c.l.bf16 %v1683_v2 }
 0x4e4   :  { %1656 = vmatpush2.msra.mxu1 %v1568_v40  ;;  %v1681_v40 = vld [vmem:[#allocation4 + $0x220] sm:$0xff] }
 0x4e5   :  { %1657 = vmatprep.subr.mxu1 %v1567_v41  ;;  %v1720_v41 = vunpack.c.h.bf16 %v1682_v34 }
 0x4e6   :  { %1658 = vmatpush2.msra.mxu1 %v1566_v43  ;;  %v1719_v43 = vunpack.c.l.bf16 %v1682_v34 }
 0x4e7   :  { %1659 = vmatprep.subr.mxu1 %v1565_v59 }
 0x4e8   :  { %1660 = vmatpush2.msra.mxu1 %v1564_v3 }
 0x4e9   :  { %1661 = vmatprep.subr.mxu1 %v1563_v15  ;;  %v1768_v15 = vunpack.c.h.bf16 %v1706_v13 }
 0x4ea   :  { %1662 = vmatpush2.msra.mxu1 %v1562_v16  ;;  %v1767_v16 = vunpack.c.l.bf16 %v1706_v13  ;;  %v1872_v13 = vld [vmem:[#allocation4 + $0x360] sm:$0xff] }
 0x4eb   :  { %1663 = vmatprep.subr.mxu1 %v1561_v9  ;;  %v1766_v9 = vunpack.c.h.bf16 %v1705_v14 }
 0x4ec   :  { %1664 = vmatpush2.msra.mxu1 %v1560_v18  ;;  %v1765_v18 = vunpack.c.l.bf16 %v1705_v14  ;;  %v1871_v14 = vld [vmem:[#allocation4 + $0x358] sm:$0xff] }
 0x4ed   :  { %1665 = vmatprep.subr.mxu1 %v1559_v21  ;;  %v1764_v21 = vunpack.c.h.bf16 %v1704_v17 }
 0x4ee   :  { %1666 = vmatpush2.msra.mxu1 %v1558_v22  ;;  %v1763_v22 = vunpack.c.l.bf16 %v1704_v17  ;;  %v1870_v17 = vld [vmem:[#allocation4 + $0x350] sm:$0xff] }
 0x56f   :  { %v1283_v45 = vpop.f32.mrf.mxu1 }
 0x570   :  { %v1288_v47 = vrot.slane %v1283_v45, 4 }
 0x571   :  { %v2510_v49 = vpop.f32.mrf.mxu1 }
 0x572   :  { %v1290_v51 = vmax.f32 %v1283_v45, %v1288_v47  ;;  %v1718_v47 = vunpack.c.h.bf16 %v1681_v40  ;;  %v1717_v49 = vunpack.c.l.bf16 %v1681_v40 }
 0x574   :  { %v1291_v54 = vsub.f32 %v1283_v45, %v1290_v51  ;;  %v1295_v55 = vrot.slane %v1290_v51, 4  ;;  %v1679_v51 = vld [vmem:[#allocation4 + $0x210] sm:$0xff] }
 0x576   :  { %v1297_v57 = vsub.f32 %v1283_v45, %v1295_v55  ;;  %v1292_v60 = vmul.f32 1.442695, %v1291_v54  ;;  %v1680_v45 = vld [vmem:[#allocation4 + $0x218] sm:$0xff] }
 0x577   :  { %v1716_v54 = vunpack.c.h.bf16 %v1680_v45  ;;  %v1715_v55 = vunpack.c.l.bf16 %v1680_v45 }
 0x578   :  { %v1298_v62 = vmul.f32 1.442695, %v1297_v57  ;;  %v1678_v57 = vld [vmem:[#allocation4 + $0x208] sm:$0xff] }
 0x57a   :  { %2531 = vpow2.f32 %v1298_v62  ;;  %v1713_v62 = vunpack.c.l.bf16 %v1679_v51 }
 0x57b   :  { %2533 = vpow2.f32 %v1292_v60  ;;  %v1714_v60 = vunpack.c.h.bf16 %v1679_v51 }
 0x587   :  { %v2532_v1 = vpop.eup %2531 }
 0x588   :  { %v1301_v4 = vrot.slane %v2532_v1, 4  ;;  %v2534_v7 = vpop.eup %2533 }
 0x58a   :  { %v1303_v8 = vadd.f32 %v2534_v7, %v1301_v4  ;;  %v1712_v4 = vunpack.c.h.bf16 %v1678_v57 }
 0x58c   :  { %2535 = vrcp.f32 %v1303_v8  ;;  %v1708_v8 = vld [vmem:[#allocation4 + $0x2f8] sm:$0xff] }
 0x599   :  { %v2536_v10 = vpop.eup %2535 }
 0x59a   :  { %v1307_v11 = vrot.slane %v2536_v10, 4  ;;  %v1305_v12 = vmul.f32 %v2536_v10, %v2534_v7  ;;  %v1711_v7 = vunpack.c.l.bf16 %v1678_v57 }
 0x59c   :  { %v1309_v0 = vmul.f32 %v2532_v1, %v1307_v11  ;;  %v1677_v1 = vld [vmem:[#allocation4 + $0x200] sm:$0xff] }
 0x59d   :  { %v1710_v10 = vunpack.c.h.bf16 %v1677_v1  ;;  %v1709_v11 = vunpack.c.l.bf16 %v1677_v1 }
 0x59e   :  { %v1310_v52 = vsel %vm771_vm2, %v1305_v12, %v1309_v0  ;;  %v1707_v12 = vld [vmem:[#allocation4 + $0x2f0] sm:$0xff]  ;;  %v1772_v0 = vunpack.c.h.bf16 %v1708_v8 }
 0x59f   :  { %1485 = vmatmul.mubr.f32.vlgmr.msra.gmra.mxu0 %v1310_v52  ;;  %v1771_v52 = vunpack.c.l.bf16 %v1708_v8  ;;  %v1770_v59 = vunpack.c.h.bf16 %v1707_v12  ;;  %v1769_v3 = vunpack.c.l.bf16 %v1707_v12  ;;  %v1874_v8 = vld [vmem:[#allocation4 + $0x370] sm:$0xff] }
 0x5a0   :  { %1787 = vmatpush1.msra.mxu0 %v1739_v25  ;;  %v1701_v25 = vld [vmem:[#allocation4 + $0x2c0] sm:$0xff] }
 0x5a1   :  { %1788 = vmatprep.subr.mxu0 %v1738_v27  ;;  %v1759_v27 = vunpack.c.l.bf16 %v1702_v23  ;;  %v1758_v29 = vunpack.c.h.bf16 %v1701_v25  ;;  %v1868_v23 = vld [vmem:[#allocation4 + $0x340] sm:$0xff] }
 0x5a2   :  { %1789 = vmatpush1.msra.mxu0 %v1737_v28  ;;  %v1700_v28 = vld [vmem:[#allocation4 + $0x2b8] sm:$0xff] }
 0x5a3   :  { %1790 = vmatprep.subr.mxu0 %v1736_v30  ;;  %v1757_v30 = vunpack.c.l.bf16 %v1701_v25  ;;  %v1756_v32 = vunpack.c.h.bf16 %v1700_v28  ;;  %v1867_v25 = vld [vmem:[#allocation4 + $0x338] sm:$0xff] }
 0x5a4   :  { %1791 = vmatpush1.msra.mxu0 %v1735_v31  ;;  %v1699_v31 = vld [vmem:[#allocation4 + $0x2b0] sm:$0xff] }
 0x5a5   :  { %1792 = vmatprep.subr.mxu0 %v1734_v33  ;;  %v1755_v33 = vunpack.c.l.bf16 %v1700_v28  ;;  %v1754_v38 = vunpack.c.h.bf16 %v1699_v31  ;;  %v1866_v28 = vld [vmem:[#allocation4 + $0x330] sm:$0xff] }
 0x5a6   :  { %1793 = vmatpush1.msra.mxu0 %v1733_v37  ;;  %v1698_v37 = vld [vmem:[#allocation4 + $0x2a8] sm:$0xff] }
 0x5a7   :  { %1794 = vmatprep.subr.mxu0 %v1732_v39  ;;  %v1753_v39 = vunpack.c.l.bf16 %v1699_v31  ;;  %v1752_v44 = vunpack.c.h.bf16 %v1698_v37  ;;  %v1865_v31 = vld [vmem:[#allocation4 + $0x328] sm:$0xff] }
 0x5a8   :  { %1795 = vmatpush1.msra.mxu0 %v1731_v42  ;;  %v1697_v42 = vld [vmem:[#allocation4 + $0x2a0] sm:$0xff] }
 0x5a9   :  { %1796 = vmatprep.subr.mxu0 %v1730_v46  ;;  %v1751_v46 = vunpack.c.l.bf16 %v1698_v37  ;;  %v1749_v50 = vunpack.c.l.bf16 %v1697_v42  ;;  %v1864_v37 = vld [vmem:[#allocation4 + $0x320] sm:$0xff] }
 0x5aa   :  { %1797 = vmatpush1.msra.mxu0 %v1729_v48  ;;  %v1750_v48 = vunpack.c.h.bf16 %v1697_v42  ;;  %v1863_v42 = vld [vmem:[#allocation4 + $0x318] sm:$0xff] }
 0x5ab   :  { %1798 = vmatprep.subr.mxu0 %v1728_v53  ;;  %v1410_v53 = vlaneseq }
 0x5ac   :  { %1799 = vmatpush1.msra.mxu0 %v1727_v56 }
 0x5ad   :  { %1800 = vmatprep.subr.mxu0 %v1726_v61  ;;  %v1411_v56 = vshrl.u32 %v1410_v53, 7  ;;  %v1408_v61 = vld [vmem:[%s2945_s4] sm:$0x3]  ;;  %v1898_v53 = vunpack.c.l.bf16 %v1863_v42 }
 0x5ae   :  { %1801 = vmatpush1.msra.mxu0 %v1725_v63 }
 0x5af   :  { %1802 = vmatprep.subr.mxu0 %v1724_v5  ;;  %v2906_v58 = vsub.s32 0, %v1411_v56  ;;  %v2911_v63 = vsub.s32 1, %v1411_v56  ;;  %v1861_v56 = vld [vmem:[#allocation4 + $0x308] sm:$0xff] }
 0x5b0   :  { %1803 = vmatpush1.msra.mxu0 %v1723_v6 }
 0x5b1   :  { %1804 = vmatprep.subr.mxu0 %v1722_v35  ;;  %v1413_v2 = vrot.slane %v1408_v61, %v2906_v58  ;;  %v1417_v5 = vrot.slane %v1408_v61, %v2911_v63 }
 0x5b2   :  { %1805 = vmatpush1.msra.mxu0 %v1721_v36 }
 0x5b3   :  { %1806 = vmatprep.subr.mxu0 %v1720_v41 }
 0x5b4   :  { %1807 = vmatpush1.msra.mxu0 %v1719_v43  ;;  %v1696_v43 = vld [vmem:[#allocation4 + $0x298] sm:$0xff] }
 0x5b5   :  { %1808 = vmatprep.subr.mxu0 %v1718_v47  ;;  %v1748_v45 = vunpack.c.h.bf16 %v1696_v43  ;;  %v1747_v47 = vunpack.c.l.bf16 %v1696_v43 }
 0x5b6   :  { %1809 = vmatpush1.msra.mxu0 %v1717_v49  ;;  %v1695_v49 = vld [vmem:[#allocation4 + $0x290] sm:$0xff] }
 0x5b7   :  { %1810 = vmatprep.subr.mxu0 %v1716_v54  ;;  %v1746_v51 = vunpack.c.h.bf16 %v1695_v49  ;;  %v1745_v54 = vunpack.c.l.bf16 %v1695_v49 }
 0x5b8   :  { %1811 = vmatpush1.msra.mxu0 %v1715_v55  ;;  %v1694_v55 = vld [vmem:[#allocation4 + $0x288] sm:$0xff] }
 0x5b9   :  { %1812 = vmatprep.subr.mxu0 %v1714_v60  ;;  %v1744_v57 = vunpack.c.h.bf16 %v1694_v55  ;;  %v1743_v60 = vunpack.c.l.bf16 %v1694_v55 }
 0x5ba   :  { %1813 = vmatpush1.msra.mxu0 %v1713_v62  ;;  %v1693_v62 = vld [vmem:[#allocation4 + $0x280] sm:$0xff] }
 0x5bb   :  { %1814 = vmatprep.subr.mxu0 %v1712_v4  ;;  %v1742_v1 = vunpack.c.h.bf16 %v1693_v62  ;;  %v1741_v4 = vunpack.c.l.bf16 %v1693_v62 }
 0x5bc   :  { %1815 = vmatpush1.msra.mxu0 %v1711_v7  ;;  %v1875_v7 = vld [vmem:[#allocation4 + $0x378] sm:$0xff] }
 0x5bd   :  { %1816 = vmatprep.subr.mxu0 %v1710_v10  ;;  %v1873_v10 = vld [vmem:[#allocation4 + $0x368] sm:$0xff]  ;;  %v1923_v12 = vunpack.c.h.bf16 %v1875_v7 }
 0x5be   :  { %1817 = vmatpush1.msra.mxu0 %v1709_v11  ;;  %v1922_v11 = vunpack.c.l.bf16 %v1875_v7 }
 0x5bf   :  { %1818 = vmatprep.subr.mxu0 %v1772_v0  ;;  %v1921_v0 = vunpack.c.h.bf16 %v1874_v8  ;;  %1969 = vmatprep.subr.mxu1 %v1923_v12 }
 0x5c0   :  { %1819 = vmatpush2.msra.mxu0 %v1771_v52  ;;  %v1920_v52 = vunpack.c.l.bf16 %v1874_v8 }
 0x5c1   :  { %1820 = vmatprep.subr.mxu0 %v1770_v59  ;;  %v1919_v59 = vunpack.c.h.bf16 %v1873_v10 }
 0x5c2   :  { %1821 = vmatpush2.msra.mxu0 %v1769_v3  ;;  %v1918_v3 = vunpack.c.l.bf16 %v1873_v10  ;;  %v1885_v10 = vld [vmem:[#allocation4 + $0x3c8] sm:$0xff] }
 0x5c3   :  { %1822 = vmatprep.subr.mxu0 %v1768_v15  ;;  %v1917_v15 = vunpack.c.h.bf16 %v1872_v13 }
 0x5c4   :  { %1823 = vmatpush2.msra.mxu0 %v1767_v16  ;;  %v1916_v16 = vunpack.c.l.bf16 %v1872_v13  ;;  %v1942_v13 = vunpack.c.l.bf16 %v1885_v10 }
 0x5c5   :  { %1824 = vmatprep.subr.mxu0 %v1766_v9  ;;  %v1915_v9 = vunpack.c.h.bf16 %v1871_v14 }
 0x5c6   :  { %1825 = vmatpush2.msra.mxu0 %v1765_v18  ;;  %v1914_v18 = vunpack.c.l.bf16 %v1871_v14 }
 0x5c7   :  { %1826 = vmatprep.subr.mxu0 %v1764_v21  ;;  %v1913_v21 = vunpack.c.h.bf16 %v1870_v17 }
 0x5c8   :  { %1827 = vmatpush2.msra.mxu0 %v1763_v22  ;;  %v1912_v22 = vunpack.c.l.bf16 %v1870_v17 }
 0x5c9   :  { %1828 = vmatprep.subr.mxu0 %v1762_v24  ;;  %v1911_v24 = vunpack.c.h.bf16 %v1869_v19 }
 0x5ca   :  { %1829 = vmatpush2.msra.mxu0 %v1761_v20  ;;  %v1910_v20 = vunpack.c.l.bf16 %v1869_v19 }
 0x5cb   :  { %1830 = vmatprep.subr.mxu0 %v1760_v26  ;;  %v1909_v26 = vunpack.c.h.bf16 %v1868_v23 }
 0x5cc   :  { %1831 = vmatpush2.msra.mxu0 %v1759_v27  ;;  %v1908_v27 = vunpack.c.l.bf16 %v1868_v23 }
 0x5cd   :  { %1832 = vmatprep.subr.mxu0 %v1758_v29  ;;  %v1907_v29 = vunpack.c.h.bf16 %v1867_v25 }
 0x5ce   :  { %1833 = vmatpush2.msra.mxu0 %v1757_v30  ;;  %v1906_v30 = vunpack.c.l.bf16 %v1867_v25  ;;  %v2235_v25 = vld [vmem:[%s2945_s4 + $0x2] sm:$0x3] }
 0x5cf   :  { %1834 = vmatprep.subr.mxu0 %v1756_v32  ;;  %v1905_v32 = vunpack.c.h.bf16 %v1866_v28 }
 0x5d0   :  { %1835 = vmatpush2.msra.mxu0 %v1755_v33  ;;  %v1904_v33 = vunpack.c.l.bf16 %v1866_v28 }
 0x5d1   :  { %1836 = vmatprep.subr.mxu0 %v1754_v38  ;;  %v1903_v38 = vunpack.c.h.bf16 %v1865_v31 }
 0x5d2   :  { %1837 = vmatpush2.msra.mxu0 %v1753_v39  ;;  %v1902_v39 = vunpack.c.l.bf16 %v1865_v31 }
 0x5d3   :  { %1838 = vmatprep.subr.mxu0 %v1752_v44  ;;  %v1901_v44 = vunpack.c.h.bf16 %v1864_v37 }
 0x5d4   :  { %1839 = vmatpush2.msra.mxu0 %v1751_v46  ;;  %v1900_v46 = vunpack.c.l.bf16 %v1864_v37  ;;  %v1879_v37 = vld [vmem:[#allocation4 + $0x398] sm:$0xff] }
 0x5d5   :  { %1840 = vmatprep.subr.mxu0 %v1750_v48  ;;  %v1862_v48 = vld [vmem:[#allocation4 + $0x310] sm:$0xff] }
 0x5d6   :  { %1841 = vmatpush2.msra.mxu0 %v1749_v50  ;;  %v1899_v50 = vunpack.c.h.bf16 %v1863_v42  ;;  %v1897_v61 = vunpack.c.h.bf16 %v1862_v48  ;;  %v1878_v42 = vld [vmem:[#allocation4 + $0x390] sm:$0xff] }
 0x5d7   :  { %1842 = vmatprep.subr.mxu0 %v1748_v45 }
 0x5d8   :  { %1843 = vmatpush2.msra.mxu0 %v1747_v47  ;;  %v1889_v47 = vld [vmem:[#allocation4 + $0x3e8] sm:$0xff] }
 0x5d9   :  { %1844 = vmatprep.subr.mxu0 %v1746_v51  ;;  %v1951_v55 = vunpack.c.h.bf16 %v1889_v47 }
 0x5da   :  { %1845 = vmatpush2.msra.mxu0 %v1745_v54  ;;  %v1888_v54 = vld [vmem:[#allocation4 + $0x3e0] sm:$0xff] }
 0x5db   :  { %1846 = vmatprep.subr.mxu0 %v1744_v57  ;;  %v1950_v57 = vunpack.c.l.bf16 %v1889_v47  ;;  %v1949_v62 = vunpack.c.h.bf16 %v1888_v54 }
 0x5dc   :  { %1847 = vmatpush2.msra.mxu0 %v1743_v60  ;;  %v1887_v60 = vld [vmem:[#allocation4 + $0x3d8] sm:$0xff] }
 0x5dd   :  { %1848 = vmatprep.subr.mxu0 %v1742_v1  ;;  %v1948_v1 = vunpack.c.l.bf16 %v1888_v54  ;;  %v1947_v7 = vunpack.c.h.bf16 %v1887_v60  ;;  %v1946_v8 = vunpack.c.l.bf16 %v1887_v60 }
 0x5de   :  { %1849 = vmatpush2.msra.mxu0 %v1741_v4  ;;  %v1886_v4 = vld [vmem:[#allocation4 + $0x3d0] sm:$0xff] }
 0x5df   :  { %v1944_v12 = vunpack.c.l.bf16 %v1886_v4 }
 0x65f   :  { %v1486_v6 = vpop.f32.mrf.mxu0 }
 0x660   :  { %v1487_v34 = vadd.f32 %v1486_v6, %v1413_v2  ;;  %v1896_v2 = vunpack.c.l.bf16 %v1862_v48  ;;  %v1895_v6 = vunpack.c.h.bf16 %v1861_v56  ;;  %v1877_v48 = vld [vmem:[#allocation4 + $0x388] sm:$0xff] }
 0x661   :  { %v1488_v35 = vpop.f32.mrf.mxu0 }
 0x662   :  { %v1489_v36 = vadd.f32 %v1488_v35, %v1417_v5  ;;  %v1491_v41 = vmax.f32 %v1487_v34, 0.0  ;;  %v1860_v5 = vld [vmem:[#allocation4 + $0x300] sm:$0xff]  ;;  %v1894_v34 = vunpack.c.l.bf16 %v1861_v56  ;;  %v1891_v35 = vld [vmem:[#allocation4 + $0x3f8] sm:$0xff] }
 0x663   :  { %v1955_v43 = vunpack.c.h.bf16 %v1891_v35  ;;  %v1954_v45 = vunpack.c.l.bf16 %v1891_v35  ;;  %v1876_v56 = vld [vmem:[#allocation4 + $0x380] sm:$0xff] }
 0x664   :  { %v1492_v40 = vmax.f32 %v1489_v36, 0.0  ;;  %v1893_v36 = vunpack.c.h.bf16 %v1860_v5 }
 0x666   :  { %1667 = vmatprep.mubr.f32.mxu1 %v1492_v40  ;;  %v1892_v40 = vunpack.c.l.bf16 %v1860_v5  ;;  %v2058_v5 = vld [vmem:[#allocation4 + $0x478] sm:$0xff] }
 0x667   :  { %1668 = vmatmul.mubr.f32.vlgmr.msra.gmra.mxu1 %v1491_v41  ;;  %v1890_v41 = vld [vmem:[#allocation4 + $0x3f0] sm:$0xff]  ;;  %v2105_v35 = vunpack.c.l.bf16 %v2058_v5 }
 0x668   :  { %1970 = vmatpush1.msra.mxu1 %v1922_v11  ;;  %v1953_v49 = vunpack.c.h.bf16 %v1890_v41  ;;  %v1952_v51 = vunpack.c.l.bf16 %v1890_v41  ;;  %v1945_v11 = vunpack.c.h.bf16 %v1886_v4 }
 0x669   :  { %1971 = vmatprep.subr.mxu1 %v1921_v0  ;;  %v1884_v0 = vld [vmem:[#allocation4 + $0x3c0] sm:$0xff] }
 0x66a   :  { %1972 = vmatpush1.msra.mxu1 %v1920_v52  ;;  %v1943_v52 = vunpack.c.h.bf16 %v1885_v10  ;;  %v1940_v14 = vunpack.c.l.bf16 %v1884_v0 }
 0x66b   :  { %1973 = vmatprep.subr.mxu1 %v1919_v59  ;;  %v1883_v59 = vld [vmem:[#allocation4 + $0x3b8] sm:$0xff] }
 0x66c   :  { %1974 = vmatpush1.msra.mxu1 %v1918_v3  ;;  %v1941_v3 = vunpack.c.h.bf16 %v1884_v0  ;;  %v1938_v17 = vunpack.c.l.bf16 %v1883_v59 }
 0x66d   :  { %1975 = vmatprep.subr.mxu1 %v1917_v15  ;;  %v1882_v15 = vld [vmem:[#allocation4 + $0x3b0] sm:$0xff] }
 0x66e   :  { %1976 = vmatpush1.msra.mxu1 %v1916_v16  ;;  %v1939_v16 = vunpack.c.h.bf16 %v1883_v59  ;;  %v1936_v19 = vunpack.c.l.bf16 %v1882_v15 }
 0x66f   :  { %1977 = vmatprep.subr.mxu1 %v1915_v9  ;;  %v1881_v9 = vld [vmem:[#allocation4 + $0x3a8] sm:$0xff] }
 0x670   :  { %1978 = vmatpush1.msra.mxu1 %v1914_v18  ;;  %v1937_v18 = vunpack.c.h.bf16 %v1882_v15  ;;  %v1934_v23 = vunpack.c.l.bf16 %v1881_v9 }
 0x671   :  { %1979 = vmatprep.subr.mxu1 %v1913_v21  ;;  %v1880_v21 = vld [vmem:[#allocation4 + $0x3a0] sm:$0xff] }
 0x672   :  { %1980 = vmatpush1.msra.mxu1 %v1912_v22  ;;  %v1935_v22 = vunpack.c.h.bf16 %v1881_v9 }
 0x673   :  { %1981 = vmatprep.subr.mxu1 %v1911_v24  ;;  %v1933_v24 = vunpack.c.h.bf16 %v1880_v21 }
 0x674   :  { %1982 = vmatpush1.msra.mxu1 %v1910_v20  ;;  %v1932_v20 = vunpack.c.l.bf16 %v1880_v21 }
 0x675   :  { %1983 = vmatprep.subr.mxu1 %v1909_v26  ;;  %v1596_v26 = vrot.slane %v2235_v25, %v2906_v58 }
 0x676   :  { %1984 = vmatpush1.msra.mxu1 %v1908_v27  ;;  %v1600_v27 = vrot.slane %v2235_v25, %v2911_v63 }
 0x677   :  { %1985 = vmatprep.subr.mxu1 %v1907_v29 }
 0x678   :  { %1986 = vmatpush1.msra.mxu1 %v1906_v30 }
 0x679   :  { %1987 = vmatprep.subr.mxu1 %v1905_v32 }
 0x67a   :  { %1988 = vmatpush1.msra.mxu1 %v1904_v33 }
 0x67b   :  { %1989 = vmatprep.subr.mxu1 %v1903_v38  ;;  %v1931_v38 = vunpack.c.h.bf16 %v1879_v37 }
 0x67c   :  { %1990 = vmatpush1.msra.mxu1 %v1902_v39  ;;  %v1930_v39 = vunpack.c.l.bf16 %v1879_v37 }
 0x67d   :  { %1991 = vmatprep.subr.mxu1 %v1901_v44  ;;  %v1929_v44 = vunpack.c.h.bf16 %v1878_v42 }
 0x67e   :  { %1992 = vmatpush1.msra.mxu1 %v1900_v46  ;;  %v1928_v46 = vunpack.c.l.bf16 %v1878_v42 }
 0x67f   :  { %1993 = vmatprep.subr.mxu1 %v1899_v50  ;;  %v1927_v50 = vunpack.c.h.bf16 %v1877_v48 }
 0x680   :  { %1994 = vmatpush1.msra.mxu1 %v1898_v53  ;;  %v1926_v53 = vunpack.c.l.bf16 %v1877_v48 }
 0x681   :  { %1995 = vmatprep.subr.mxu1 %v1897_v61  ;;  %v1925_v61 = vunpack.c.h.bf16 %v1876_v56 }
 0x682   :  { %1996 = vmatpush1.msra.mxu1 %v1896_v2  ;;  %v1924_v2 = vunpack.c.l.bf16 %v1876_v56 }
 0x683   :  { %1997 = vmatprep.subr.mxu1 %v1895_v6  ;;  %v2057_v6 = vld [vmem:[#allocation4 + $0x470] sm:$0xff] }
 0x684   :  { %1998 = vmatpush1.msra.mxu1 %v1894_v34  ;;  %v2056_v34 = vld [vmem:[#allocation4 + $0x468] sm:$0xff]  ;;  %v2103_v41 = vunpack.c.l.bf16 %v2057_v6 }
 0x685   :  { %1999 = vmatprep.subr.mxu1 %v1893_v36  ;;  %v2106_v36 = vunpack.c.h.bf16 %v2058_v5  ;;  %v2101_v47 = vunpack.c.l.bf16 %v2056_v34 }
 0x686   :  { %2000 = vmatpush1.msra.mxu1 %v1892_v40  ;;  %v2104_v40 = vunpack.c.h.bf16 %v2057_v6 }
 0x687   :  { %2001 = vmatprep.subr.mxu1 %v1955_v43  ;;  %v2055_v43 = vld [vmem:[#allocation4 + $0x460] sm:$0xff]  ;;  %2152 = vmatprep.subr.mxu0 %v2106_v36 }
 0x688   :  { %2002 = vmatpush2.msra.mxu1 %v1954_v45  ;;  %v2102_v45 = vunpack.c.h.bf16 %v2056_v34  ;;  %v2099_v54 = vunpack.c.l.bf16 %v2055_v43  ;;  %v2068_v34 = vld [vmem:[#allocation4 + $0x4c8] sm:$0xff] }
 0x689   :  { %2003 = vmatprep.subr.mxu1 %v1953_v49  ;;  %v2054_v49 = vld [vmem:[#allocation4 + $0x458] sm:$0xff] }
 0x68a   :  { %2004 = vmatpush2.msra.mxu1 %v1952_v51  ;;  %v2100_v51 = vunpack.c.h.bf16 %v2055_v43  ;;  %v2097_v60 = vunpack.c.l.bf16 %v2054_v49  ;;  %v2125_v43 = vunpack.c.l.bf16 %v2068_v34 }
 0x68b   :  { %2005 = vmatprep.subr.mxu1 %v1951_v55  ;;  %v2053_v55 = vld [vmem:[#allocation4 + $0x450] sm:$0xff] }
 0x68c   :  { %2006 = vmatpush2.msra.mxu1 %v1950_v57  ;;  %v2098_v57 = vunpack.c.h.bf16 %v2054_v49  ;;  %v2095_v4 = vunpack.c.l.bf16 %v2053_v55 }
 0x68d   :  { %2007 = vmatprep.subr.mxu1 %v1949_v62  ;;  %v2052_v62 = vld [vmem:[#allocation4 + $0x448] sm:$0xff] }
 0x68e   :  { %2008 = vmatpush2.msra.mxu1 %v1948_v1  ;;  %v2096_v1 = vunpack.c.h.bf16 %v2053_v55  ;;  %v2093_v10 = vunpack.c.l.bf16 %v2052_v62 }
 0x68f   :  { %2009 = vmatprep.subr.mxu1 %v1947_v7  ;;  %v2051_v7 = vld [vmem:[#allocation4 + $0x440] sm:$0xff] }
 0x690   :  { %2010 = vmatpush2.msra.mxu1 %v1946_v8  ;;  %v2094_v8 = vunpack.c.h.bf16 %v2052_v62  ;;  %v2091_v0 = vunpack.c.l.bf16 %v2051_v7 }
 0x691   :  { %2011 = vmatprep.subr.mxu1 %v1945_v11  ;;  %v2050_v11 = vld [vmem:[#allocation4 + $0x438] sm:$0xff] }
 0x692   :  { %2012 = vmatpush2.msra.mxu1 %v1944_v12  ;;  %v2092_v12 = vunpack.c.h.bf16 %v2051_v7  ;;  %v2089_v59 = vunpack.c.l.bf16 %v2050_v11 }
 0x693   :  { %2013 = vmatprep.subr.mxu1 %v1943_v52  ;;  %v2049_v52 = vld [vmem:[#allocation4 + $0x430] sm:$0xff] }
 0x694   :  { %2014 = vmatpush2.msra.mxu1 %v1942_v13  ;;  %v2090_v13 = vunpack.c.h.bf16 %v2050_v11  ;;  %v2087_v15 = vunpack.c.l.bf16 %v2049_v52  ;;  %v2236_v11 = vld [vmem:[%s2945_s4 + $0x4] sm:$0x3] }
 0x695   :  { %2015 = vmatprep.subr.mxu1 %v1941_v3  ;;  %v2048_v3 = vld [vmem:[#allocation4 + $0x428] sm:$0xff] }
 0x696   :  { %2016 = vmatpush2.msra.mxu1 %v1940_v14  ;;  %v2088_v14 = vunpack.c.h.bf16 %v2049_v52  ;;  %v2085_v9 = vunpack.c.l.bf16 %v2048_v3 }
 0x697   :  { %2017 = vmatprep.subr.mxu1 %v1939_v16  ;;  %v2047_v16 = vld [vmem:[#allocation4 + $0x420] sm:$0xff] }
 0x698   :  { %2018 = vmatpush2.msra.mxu1 %v1938_v17  ;;  %v2086_v17 = vunpack.c.h.bf16 %v2048_v3  ;;  %v2083_v21 = vunpack.c.l.bf16 %v2047_v16 }
 0x699   :  { %2019 = vmatprep.subr.mxu1 %v1937_v18  ;;  %v2046_v18 = vld [vmem:[#allocation4 + $0x418] sm:$0xff] }
 0x69a   :  { %2020 = vmatpush2.msra.mxu1 %v1936_v19  ;;  %v2084_v19 = vunpack.c.h.bf16 %v2047_v16  ;;  %v2062_v16 = vld [vmem:[#allocation4 + $0x498] sm:$0xff] }
 0x69b   :  { %2021 = vmatprep.subr.mxu1 %v1935_v22  ;;  %v2045_v22 = vld [vmem:[#allocation4 + $0x410] sm:$0xff] }
 0x69c   :  { %2022 = vmatpush2.msra.mxu1 %v1934_v23  ;;  %v2082_v23 = vunpack.c.h.bf16 %v2046_v18  ;;  %v2080_v25 = vunpack.c.h.bf16 %v2045_v22 }
 0x69d   :  { %2023 = vmatprep.subr.mxu1 %v1933_v24  ;;  %v2081_v24 = vunpack.c.l.bf16 %v2046_v18  ;;  %v2061_v18 = vld [vmem:[#allocation4 + $0x490] sm:$0xff] }
 0x69e   :  { %2024 = vmatpush2.msra.mxu1 %v1932_v20  ;;  %v2044_v20 = vld [vmem:[#allocation4 + $0x408] sm:$0xff] }
 0x69f   :  { %2025 = vmatprep.subr.mxu1 %v1931_v38 }
 0x6a0   :  { %2026 = vmatpush2.msra.mxu1 %v1930_v39  ;;  %v2072_v39 = vld [vmem:[#allocation4 + $0x4e8] sm:$0xff] }
 0x6a1   :  { %2027 = vmatprep.subr.mxu1 %v1929_v44  ;;  %v2134_v48 = vunpack.c.h.bf16 %v2072_v39 }
 0x6a2   :  { %2028 = vmatpush2.msra.mxu1 %v1928_v46  ;;  %v2071_v46 = vld [vmem:[#allocation4 + $0x4e0] sm:$0xff] }
 0x6a3   :  { %2029 = vmatprep.subr.mxu1 %v1927_v50  ;;  %v2133_v50 = vunpack.c.l.bf16 %v2072_v39  ;;  %v2132_v56 = vunpack.c.h.bf16 %v2071_v46  ;;  %v2238_v39 = vld [vmem:[%s2945_s4 + $0x8] sm:$0x3] }
 0x6a4   :  { %2030 = vmatpush2.msra.mxu1 %v1926_v53  ;;  %v2070_v53 = vld [vmem:[#allocation4 + $0x4d8] sm:$0xff] }
 0x6a5   :  { %2031 = vmatprep.subr.mxu1 %v1925_v61  ;;  %v2131_v61 = vunpack.c.l.bf16 %v2071_v46  ;;  %v2130_v5 = vunpack.c.h.bf16 %v2070_v53  ;;  %v2129_v6 = vunpack.c.l.bf16 %v2070_v53 }
 0x6a6   :  { %2032 = vmatpush2.msra.mxu1 %v1924_v2  ;;  %v2069_v2 = vld [vmem:[#allocation4 + $0x4d0] sm:$0xff] }
 0x6a7   :  { %v2127_v36 = vunpack.c.l.bf16 %v2069_v2 }
 0x727   :  { %v1669_v28 = vpop.f32.mrf.mxu1 }
 0x728   :  { %v1670_v29 = vadd.f32 %v1669_v28, %v1596_v26  ;;  %v2079_v26 = vunpack.c.l.bf16 %v2045_v22  ;;  %v2078_v28 = vunpack.c.h.bf16 %v2044_v20  ;;  %v2060_v22 = vld [vmem:[#allocation4 + $0x488] sm:$0xff] }
 0x729   :  { %v1671_v30 = vpop.f32.mrf.mxu1 }
 0x72a   :  { %v1672_v31 = vadd.f32 %v1671_v30, %v1600_v27  ;;  %v1674_v33 = vmax.f32 %v1670_v29, 0.0  ;;  %v2043_v27 = vld [vmem:[#allocation4 + $0x400] sm:$0xff]  ;;  %v2077_v29 = vunpack.c.l.bf16 %v2044_v20  ;;  %v2074_v30 = vld [vmem:[#allocation4 + $0x4f8] sm:$0xff] }
 0x72b   :  { %v2138_v37 = vunpack.c.h.bf16 %v2074_v30  ;;  %v2137_v38 = vunpack.c.l.bf16 %v2074_v30  ;;  %v2059_v20 = vld [vmem:[#allocation4 + $0x480] sm:$0xff] }
 0x72c   :  { %v1675_v32 = vmax.f32 %v1672_v31, 0.0  ;;  %v2076_v31 = vunpack.c.h.bf16 %v2043_v27 }
 0x72e   :  { %1850 = vmatprep.mubr.f32.mxu0 %v1675_v32  ;;  %v2075_v32 = vunpack.c.l.bf16 %v2043_v27  ;;  %v2237_v27 = vld [vmem:[%s2945_s4 + $0x6] sm:$0x3] }
 0x72f   :  { %1851 = vmatmul.mubr.f32.vlgmr.msra.gmra.mxu0 %v1674_v33  ;;  %v2073_v33 = vld [vmem:[#allocation4 + $0x4f0] sm:$0xff] }
 0x730   :  { %2153 = vmatpush1.msra.mxu0 %v2105_v35  ;;  %v2136_v42 = vunpack.c.h.bf16 %v2073_v33  ;;  %v2135_v44 = vunpack.c.l.bf16 %v2073_v33  ;;  %v2128_v35 = vunpack.c.h.bf16 %v2069_v2 }
 0x731   :  { %2154 = vmatprep.subr.mxu0 %v2104_v40  ;;  %v2067_v40 = vld [vmem:[#allocation4 + $0x4c0] sm:$0xff] }
 0x732   :  { %2155 = vmatpush1.msra.mxu0 %v2103_v41  ;;  %v2126_v41 = vunpack.c.h.bf16 %v2068_v34  ;;  %v2123_v49 = vunpack.c.l.bf16 %v2067_v40 }
 0x733   :  { %2156 = vmatprep.subr.mxu0 %v2102_v45  ;;  %v2066_v45 = vld [vmem:[#allocation4 + $0x4b8] sm:$0xff] }
 0x734   :  { %2157 = vmatpush1.msra.mxu0 %v2101_v47  ;;  %v2124_v47 = vunpack.c.h.bf16 %v2067_v40  ;;  %v2121_v55 = vunpack.c.l.bf16 %v2066_v45 }
 0x735   :  { %2158 = vmatprep.subr.mxu0 %v2100_v51  ;;  %v2065_v51 = vld [vmem:[#allocation4 + $0x4b0] sm:$0xff] }
 0x736   :  { %2159 = vmatpush1.msra.mxu0 %v2099_v54  ;;  %v2122_v54 = vunpack.c.h.bf16 %v2066_v45  ;;  %v2119_v62 = vunpack.c.l.bf16 %v2065_v51 }
 0x737   :  { %2160 = vmatprep.subr.mxu0 %v2098_v57  ;;  %v2064_v57 = vld [vmem:[#allocation4 + $0x4a8] sm:$0xff] }
 0x738   :  { %2161 = vmatpush1.msra.mxu0 %v2097_v60  ;;  %v2120_v60 = vunpack.c.h.bf16 %v2065_v51  ;;  %v2117_v7 = vunpack.c.l.bf16 %v2064_v57 }
 0x739   :  { %2162 = vmatprep.subr.mxu0 %v2096_v1  ;;  %v2063_v1 = vld [vmem:[#allocation4 + $0x4a0] sm:$0xff] }
 0x73a   :  { %2163 = vmatpush1.msra.mxu0 %v2095_v4  ;;  %v2118_v4 = vunpack.c.h.bf16 %v2064_v57 }
 0x73b   :  { %2164 = vmatprep.subr.mxu0 %v2094_v8  ;;  %v2116_v8 = vunpack.c.h.bf16 %v2063_v1 }
 0x73c   :  { %2165 = vmatpush1.msra.mxu0 %v2093_v10  ;;  %v2115_v10 = vunpack.c.l.bf16 %v2063_v1 }
 0x73d   :  { %2166 = vmatprep.subr.mxu0 %v2092_v12  ;;  %v1779_v12 = vrot.slane %v2236_v11, %v2906_v58 }
 0x73e   :  { %2167 = vmatpush1.msra.mxu0 %v2091_v0  ;;  %v1783_v0 = vrot.slane %v2236_v11, %v2911_v63 }
 0x73f   :  { %2168 = vmatprep.subr.mxu0 %v2090_v13 }
 0x740   :  { %2169 = vmatpush1.msra.mxu0 %v2089_v59 }
 0x741   :  { %2170 = vmatprep.subr.mxu0 %v2088_v14 }
 0x742   :  { %2171 = vmatpush1.msra.mxu0 %v2087_v15 }
 0x743   :  { %2172 = vmatprep.subr.mxu0 %v2086_v17  ;;  %v2114_v17 = vunpack.c.h.bf16 %v2062_v16 }
 0x744   :  { %2173 = vmatpush1.msra.mxu0 %v2085_v9  ;;  %v2113_v9 = vunpack.c.l.bf16 %v2062_v16 }
 0x745   :  { %2174 = vmatprep.subr.mxu0 %v2084_v19  ;;  %v2112_v19 = vunpack.c.h.bf16 %v2061_v18 }
 0x746   :  { %2175 = vmatpush1.msra.mxu0 %v2083_v21  ;;  %v2111_v21 = vunpack.c.l.bf16 %v2061_v18 }
 0x747   :  { %2176 = vmatprep.subr.mxu0 %v2082_v23  ;;  %v2110_v23 = vunpack.c.h.bf16 %v2060_v22 }
 0x748   :  { %2177 = vmatpush1.msra.mxu0 %v2081_v24  ;;  %v2109_v24 = vunpack.c.l.bf16 %v2060_v22 }
 0x749   :  { %2178 = vmatprep.subr.mxu0 %v2080_v25  ;;  %v2108_v25 = vunpack.c.h.bf16 %v2059_v20 }
 0x74a   :  { %2179 = vmatpush1.msra.mxu0 %v2079_v26  ;;  %v2107_v26 = vunpack.c.l.bf16 %v2059_v20 }
 0x74b   :  { %2180 = vmatprep.subr.mxu0 %v2078_v28  ;;  %v1962_v28 = vrot.slane %v2237_v27, %v2906_v58 }
 0x74c   :  { %2181 = vmatpush1.msra.mxu0 %v2077_v29  ;;  %v1966_v29 = vrot.slane %v2237_v27, %v2911_v63 }
 0x74d   :  { %2182 = vmatprep.subr.mxu0 %v2076_v31 }
 0x74e   :  { %2183 = vmatpush1.msra.mxu0 %v2075_v32 }
 0x74f   :  { %2184 = vmatprep.subr.mxu0 %v2138_v37 }
 0x750   :  { %2185 = vmatpush2.msra.mxu0 %v2137_v38 }
 0x751   :  { %2186 = vmatprep.subr.mxu0 %v2136_v42  ;;  %v2145_v42 = vrot.slane %v2238_v39, %v2906_v58 }
 0x752   :  { %2187 = vmatpush2.msra.mxu0 %v2135_v44  ;;  %v2149_v44 = vrot.slane %v2238_v39, %v2911_v63 }
 0x753   :  { %2188 = vmatprep.subr.mxu0 %v2134_v48 }
 0x754   :  { %2189 = vmatpush2.msra.mxu0 %v2133_v50 }
 0x755   :  { %2190 = vmatprep.subr.mxu0 %v2132_v56 }
 0x756   :  { %2191 = vmatpush2.msra.mxu0 %v2131_v61 }
 0x757   :  { %2192 = vmatprep.subr.mxu0 %v2130_v5 }
 0x758   :  { %2193 = vmatpush2.msra.mxu0 %v2129_v6 }
 0x759   :  { %2194 = vmatprep.subr.mxu0 %v2128_v35 }
 0x75a   :  { %2195 = vmatpush2.msra.mxu0 %v2127_v36 }
 0x75b   :  { %2196 = vmatprep.subr.mxu0 %v2126_v41 }
 0x75c   :  { %2197 = vmatpush2.msra.mxu0 %v2125_v43 }
 0x75d   :  { %2198 = vmatprep.subr.mxu0 %v2124_v47 }
 0x75e   :  { %2199 = vmatpush2.msra.mxu0 %v2123_v49 }
 0x75f   :  { %2200 = vmatprep.subr.mxu0 %v2122_v54 }
 0x760   :  { %2201 = vmatpush2.msra.mxu0 %v2121_v55 }
 0x761   :  { %2202 = vmatprep.subr.mxu0 %v2120_v60 }
 0x762   :  { %2203 = vmatpush2.msra.mxu0 %v2119_v62 }
 0x763   :  { %2204 = vmatprep.subr.mxu0 %v2118_v4 }
 0x764   :  { %2205 = vmatpush2.msra.mxu0 %v2117_v7 }
 0x765   :  { %2206 = vmatprep.subr.mxu0 %v2116_v8 }
 0x766   :  { %2207 = vmatpush2.msra.mxu0 %v2115_v10 }
 0x767   :  { %2208 = vmatprep.subr.mxu0 %v2114_v17 }
 0x768   :  { %2209 = vmatpush2.msra.mxu0 %v2113_v9 }
 0x769   :  { %2210 = vmatprep.subr.mxu0 %v2112_v19 }
 0x76a   :  { %2211 = vmatpush2.msra.mxu0 %v2111_v21 }
 0x76b   :  { %2212 = vmatprep.subr.mxu0 %v2110_v23 }
 0x76c   :  { %2213 = vmatpush2.msra.mxu0 %v2109_v24 }
 0x76d   :  { %2214 = vmatprep.subr.mxu0 %v2108_v25 }
 0x76e   :  { %2215 = vmatpush2.msra.mxu0 %v2107_v26 }
 0x7ef   :  { %v1852_v52 = vpop.f32.mrf.mxu0 }
 0x7f0   :  { %v1853_v13 = vadd.f32 %v1852_v52, %v1779_v12 }
 0x7f1   :  { %v1854_v59 = vpop.f32.mrf.mxu0 }
 0x7f2   :  { %v1855_v3 = vadd.f32 %v1854_v59, %v1783_v0  ;;  %v1857_v15 = vmax.f32 %v1853_v13, 0.0 }
 0x7f4   :  { %v1858_v14 = vmax.f32 %v1855_v3, 0.0 }
 0x7f6   :  { %2033 = vmatprep.mubr.f32.mxu1 %v1858_v14 }
 0x7f7   :  { %2034 = vmatmul.mubr.f32.vlgmr.msra.gmra.mxu1 %v1857_v15 }
 0x8b7   :  { %v2035_v30 = vpop.f32.mrf.mxu1 }
 0x8b8   :  { %v2036_v31 = vadd.f32 %v2035_v30, %v1962_v28 }
 0x8b9   :  { %v2037_v32 = vpop.f32.mrf.mxu1 }
 0x8ba   :  { %v2038_v33 = vadd.f32 %v2037_v32, %v1966_v29  ;;  %v2040_v38 = vmax.f32 %v2036_v31, 0.0 }
 0x8bc   :  { %v2041_v37 = vmax.f32 %v2038_v33, 0.0 }
 0x8be   :  { %2216 = vmatprep.mubr.f32.mxu0 %v2041_v37 }
 0x8bf   :  { %2217 = vmatmul.mubr.f32.vlgmr.msra.gmra.mxu0 %v2040_v38 }
 0x97f   :  { %v2218_v46 = vpop.f32.mrf.mxu0 }
 0x980   :  { %v2219_v48 = vadd.f32 %v2218_v46, %v2145_v42 }
 0x981   :  { %v2220_v50 = vpop.f32.mrf.mxu0 }
 0x982   :  { %2223 = vst [vmem:[%s2946_s5] sm:$0xff] %v2219_v48  ;;  %v2221_v53 = vadd.f32 %v2220_v50, %v2149_v44 }
 0x984   :  { %2224 = vst [vmem:[%s2946_s5 + $0x8] sm:$0xff] %v2221_v53 }
 0x985   :  { %2229 = vsyncpa [#allocation3], 1 }
 0x986   :  { %2230 = vsyncpa [#allocation5], 1 }

</bundles_post_ra>
